<compile_context>
chip_gen: v7x
topology: tpu7x:2x2x1
jax: 0.10.0
libtpu: 0.0.40
codegen_flags: <defaults>
</compile_context>

<pallas_src>
import functools
import math

import jax
import jax.numpy as jnp
from jax import lax
from jax.experimental import pallas as pl
from jax.experimental.pallas import tpu as pltpu


# ----------------------------------------------------------------------------
# Pallas kernels
# ----------------------------------------------------------------------------

def _mm_kernel(x_ref, w_ref, b_ref, o_ref, *, act):
    """o = act(x @ w + b); bf16 operands, f32 accumulate/epilogue."""
    y = jnp.dot(x_ref[...], w_ref[...], preferred_element_type=jnp.float32)
    y = y + b_ref[...]
    if act == "relu":
        y = jnp.maximum(y, 0.0)
    elif act == "sigmoid":
        # 1/(1+exp(-y)) via EUP reciprocal; clip guards the tiny approx error.
        y = jnp.clip(pl.reciprocal(1.0 + jnp.exp(-y), approx=True), 0.0, 1.0)
    o_ref[...] = y.astype(o_ref.dtype)


def _mm_add_kernel(x_ref, w_ref, b_ref, a_ref, o_ref):
    """o = x @ w + b + a   (Linear with the PositionalEncoding add fused in)."""
    y = jnp.dot(x_ref[...], w_ref[...], preferred_element_type=jnp.float32)
    o_ref[...] = (y + b_ref[...] + a_ref[...]).astype(o_ref.dtype)


def _attn_block_kernel(x_ref, wqkv_ref, bqkv_ref, wo_ref, bo_ref, g_ref, beta_ref,
                       o_ref, *, n_heads, scale, eps):
    """Fused: QKV matmul -> per-head softmax(q k^T * scale) v (heads as lane slices)
    -> lane-dense (S, D) context -> out-proj -> +residual -> LayerNorm1."""
    x = x_ref[...]                                           # (S, D) bf16
    d = x.shape[-1]
    dh = d // n_heads
    qkv = jnp.dot(x, wqkv_ref[...], preferred_element_type=jnp.float32) + bqkv_ref[...]
    qkv = qkv.astype(jnp.bfloat16)                           # (S, 3D)

    ctx_heads = []
    for h in range(n_heads):                                 # static loop, lane slices in-kernel
        q_h = qkv[:, h * dh:(h + 1) * dh]
        k_h = qkv[:, d + h * dh: d + (h + 1) * dh]
        v_h = qkv[:, 2 * d + h * dh: 2 * d + (h + 1) * dh]
        s = lax.dot_general(q_h, k_h, (((1,), (1,)), ((), ())),
                            preferred_element_type=jnp.float32) * scale   # (S, S)
        s = s - jnp.max(s, axis=-1, keepdims=True)
        p = jnp.exp(s)
        p = p * pl.reciprocal(jnp.sum(p, axis=-1, keepdims=True), approx=True)
        ctx_heads.append(jnp.dot(p.astype(jnp.bfloat16), v_h,
                                 preferred_element_type=jnp.float32))
    ctx = jnp.concatenate(ctx_heads, axis=-1).astype(jnp.bfloat16)        # (S, D) lane-dense

    y = jnp.dot(ctx, wo_ref[...], preferred_element_type=jnp.float32) + bo_ref[...]
    y = y + x.astype(jnp.float32)                                         # residual
    mu = jnp.mean(y, axis=-1, keepdims=True)
    var = jnp.mean(jnp.square(y - mu), axis=-1, keepdims=True)
    o_ref[...] = ((y - mu) * lax.rsqrt(var + eps) * g_ref[...] + beta_ref[...]
                  ).astype(o_ref.dtype)


def _ffn_block_kernel(x_ref, w1_ref, b1_ref, w2_ref, b2_ref, g_ref, beta_ref, o_ref, *, eps):
    """Fused: FFN1 + ReLU + FFN2 + residual + LayerNorm2 (row-local, tiled over rows)."""
    x = x_ref[...]                                           # (tm, D) bf16
    h = jnp.dot(x, w1_ref[...], preferred_element_type=jnp.float32) + b1_ref[...]
    h = jnp.maximum(h, 0.0).astype(jnp.bfloat16)
    y = jnp.dot(h, w2_ref[...], preferred_element_type=jnp.float32) + b2_ref[...]
    y = y + x.astype(jnp.float32)                                         # residual
    mu = jnp.mean(y, axis=-1, keepdims=True)
    var = jnp.mean(jnp.square(y - mu), axis=-1, keepdims=True)
    o_ref[...] = ((y - mu) * lax.rsqrt(var + eps) * g_ref[...] + beta_ref[...]
                  ).astype(o_ref.dtype)


def _conv_pool_kernel(x_ref, w_ref, b_ref, o_ref):
    """Fused Conv(im2col) + BN(folded) + ReLU + MaxPool2d(2,2).

    x_ref: (4, tm, K) bf16 -- the 4 pooling-window corners as im2col rows.
    One matmul on the corner-stacked (4*tm, K) LHS (RHS pushed to the MXU once),
    then max over corners; maxpool(relu(conv_c + b)) == relu(max_c(conv_c) + b).
    """
    xs = x_ref[...]
    c4, tm, k = xs.shape
    cout = w_ref.shape[1]
    y = jnp.dot(xs.reshape(c4 * tm, k), w_ref[...], preferred_element_type=jnp.float32)
    y = jnp.max(y.reshape(c4, tm, cout), axis=0)
    o_ref[...] = jnp.maximum(y + b_ref[...], 0.0).astype(o_ref.dtype)


# ----------------------------------------------------------------------------
# Tiling helper + kernel wrappers
# ----------------------------------------------------------------------------

def _row_tiles(m, cap=512):
    """Row tile + grid size.  Whole array when small; otherwise >=2 balanced multiple-of-8
    tiles (v7x megacore) with a cdiv grid (partial last tile is masked by Pallas)."""
    if m <= cap:
        return m, 1
    if m <= 2 * cap:
        tm = (((m + 1) // 2) + 7) // 8 * 8
        return tm, pl.cdiv(m, tm)
    return cap, pl.cdiv(m, cap)


def matmul_bias_act(x, w, b, act="none", out_dtype=jnp.bfloat16, tm_cap=512):
    """y = act(x @ w + b); bf16 operands, f32 accumulate, dtype of consumer on the way out."""
    M, K = x.shape
    N = w.shape[1]
    tm, gm = _row_tiles(M, tm_cap)
    return pl.pallas_call(
        functools.partial(_mm_kernel, act=act),
        out_shape=jax.ShapeDtypeStruct((M, N), out_dtype),
        grid=(gm,),
        in_specs=[pl.BlockSpec((tm, K), lambda i: (i, 0)),
                  pl.BlockSpec((K, N), lambda i: (0, 0)),
                  pl.BlockSpec((1, N), lambda i: (0, 0))],
        out_specs=pl.BlockSpec((tm, N), lambda i: (i, 0)),
        compiler_params=pltpu.CompilerParams(dimension_semantics=("parallel",)),
    )(x.astype(jnp.bfloat16), w, b)


def matmul_bias_add(x, w, b, add, out_dtype=jnp.bfloat16):
    """y = x @ w + b + add  (Linear + fused PositionalEncoding add)."""
    M, K = x.shape
    N = w.shape[1]
    tm, gm = _row_tiles(M, 512)
    return pl.pallas_call(
        _mm_add_kernel,
        out_shape=jax.ShapeDtypeStruct((M, N), out_dtype),
        grid=(gm,),
        in_specs=[pl.BlockSpec((tm, K), lambda i: (i, 0)),
                  pl.BlockSpec((K, N), lambda i: (0, 0)),
                  pl.BlockSpec((1, N), lambda i: (0, 0)),
                  pl.BlockSpec((tm, N), lambda i: (i, 0))],
        out_specs=pl.BlockSpec((tm, N), lambda i: (i, 0)),
        compiler_params=pltpu.CompilerParams(dimension_semantics=("parallel",)),
    )(x.astype(jnp.bfloat16), w, b, add)


def attention_block(x, p, n_heads, eps=1e-5):
    """Fused attention sub-layer: QKV + MHA + out-proj + residual + LN1.  x: (S, D) bf16."""
    S, D = x.shape
    scale = 1.0 / math.sqrt(D // n_heads)
    return pl.pallas_call(
        functools.partial(_attn_block_kernel, n_heads=n_heads, scale=scale, eps=eps),
        out_shape=jax.ShapeDtypeStruct((S, D), jnp.bfloat16),
        grid=(1,),
        in_specs=[pl.BlockSpec((S, D), lambda i: (0, 0)),
                  pl.BlockSpec((D, 3 * D), lambda i: (0, 0)),
                  pl.BlockSpec((1, 3 * D), lambda i: (0, 0)),
                  pl.BlockSpec((D, D), lambda i: (0, 0)),
                  pl.BlockSpec((1, D), lambda i: (0, 0)),
                  pl.BlockSpec((1, D), lambda i: (0, 0)),
                  pl.BlockSpec((1, D), lambda i: (0, 0))],
        out_specs=pl.BlockSpec((S, D), lambda i: (0, 0)),
        compiler_params=pltpu.CompilerParams(dimension_semantics=("arbitrary",)),
    )(x.astype(jnp.bfloat16), p["wqkv"], p["bqkv"], p["wo"], p["bo"],
      p["ln1_g"], p["ln1_b"])


def ffn_block(x, p, eps=1e-5):
    """Fused feed-forward sub-layer: FFN1 + ReLU + FFN2 + residual + LN2.  x: (S, D) bf16."""
    S, D = x.shape
    dff = p["w1"].shape[1]
    tm, gm = _row_tiles(S, 512)
    return pl.pallas_call(
        functools.partial(_ffn_block_kernel, eps=eps),
        out_shape=jax.ShapeDtypeStruct((S, D), jnp.bfloat16),
        grid=(gm,),
        in_specs=[pl.BlockSpec((tm, D), lambda i: (i, 0)),
                  pl.BlockSpec((D, dff), lambda i: (0, 0)),
                  pl.BlockSpec((1, dff), lambda i: (0, 0)),
                  pl.BlockSpec((dff, D), lambda i: (0, 0)),
                  pl.BlockSpec((1, D), lambda i: (0, 0)),
                  pl.BlockSpec((1, D), lambda i: (0, 0)),
                  pl.BlockSpec((1, D), lambda i: (0, 0))],
        out_specs=pl.BlockSpec((tm, D), lambda i: (i, 0)),
        compiler_params=pltpu.CompilerParams(dimension_semantics=("parallel",)),
    )(x.astype(jnp.bfloat16), p["w1"], p["b1"], p["w2"], p["b2"],
      p["ln2_g"], p["ln2_b"])


def encoder_layer(x, p, n_heads):
    """nn.TransformerEncoderLayer (post-norm, relu, eval-mode dropout=identity): 2 pallas_calls."""
    x = attention_block(x, p, n_heads)
    x = ffn_block(x, p)
    return x


def conv_bn_relu_pool(x_nhwc, cp):
    """Conv2d(3x3, pad=1) + BatchNorm2d(eval, folded) + ReLU + MaxPool2d(2,2), single kernel.

    Corner-major im2col patches are built in XLA (bf16, no 6-D transpose); the kernel does a
    single corner-stacked matmul and the pooling max.
    """
    n, h, w_, cin = x_nhwc.shape
    ho, wo = h // 2, w_ // 2
    k_dim = 9 * cin
    cout = cp["w_mat"].shape[1]

    # TODO(synk): build the im2col patches inside the kernel (shifted VMEM loads) to avoid the
    #             9x HBM blow-up at larger feature-map sizes.
    xp = jnp.pad(x_nhwc, ((0, 0), (1, 1), (1, 1), (0, 0)))
    corners = []
    for ph in range(2):
        for pw in range(2):
            taps = [xp[:, ph + dh: ph + dh + 2 * ho: 2, pw + dw: pw + dw + 2 * wo: 2, :]
                    for dh in range(3) for dw in range(3)]
            corners.append(jnp.concatenate(taps, axis=-1).reshape(n * ho * wo, k_dim))
    patches = jnp.stack(corners, axis=0).astype(jnp.bfloat16)        # (4, M, K), corner-major

    m_out = n * ho * wo
    tm, gm = _row_tiles(m_out, 512)
    y = pl.pallas_call(
        _conv_pool_kernel,
        out_shape=jax.ShapeDtypeStruct((m_out, cout), jnp.bfloat16),
        grid=(gm,),
        in_specs=[pl.BlockSpec((4, tm, k_dim), lambda i: (0, i, 0)),
                  pl.BlockSpec((k_dim, cout), lambda i: (0, 0)),
                  pl.BlockSpec((1, cout), lambda i: (0, 0))],
        out_specs=pl.BlockSpec((tm, cout), lambda i: (i, 0)),
        compiler_params=pltpu.CompilerParams(dimension_semantics=("parallel",)),
    )(patches, cp["w_mat"], cp["b_f"])
    return y.reshape(n, ho, wo, cout)


def positional_encoding(seq_len, d_model):
    """Matches the torch PositionalEncoding buffer pe[:seq_len] (shape-only constant)."""
    position = jnp.arange(seq_len, dtype=jnp.float32)[:, None]
    div_term = jnp.exp(jnp.arange(0, d_model, 2, dtype=jnp.float32) *
                       (-math.log(10000.0) / d_model))
    pe = jnp.zeros((seq_len, d_model), jnp.float32)
    pe = pe.at[:, 0::2].set(jnp.sin(position * div_term))
    pe = pe.at[:, 1::2].set(jnp.cos(position * div_term)[:, : d_model // 2])
    return pe


# ----------------------------------------------------------------------------
# Full forward pass (eval mode: dropout = identity, BN uses running stats)
# ----------------------------------------------------------------------------

def cnn_transformer_forward(x_nchw, fp, cfg, pe):
    # NCHW (torch) -> NHWC (kernel layout); activations flow in bf16 between kernels.
    x = jnp.transpose(x_nchw, (0, 2, 3, 1)).astype(jnp.bfloat16)
    for cp in fp["conv"]:
        x = conv_bn_relu_pool(x, cp)

    n = x.shape[0]
    # torch does x.view(B, -1, cnn_output_size) on an NCHW tensor => seq length is 1 and
    # features are flattened in (C, H', W') order; reproduce that ordering exactly.
    feat = jnp.transpose(x, (0, 3, 1, 2)).reshape(n, -1)        # (B, cnn_output_size) bf16

    # Linear + PositionalEncoding: torch adds pe[:x.size(0)] where size(0) is the batch dim here;
    # the add is fused into the Linear matmul epilogue (dropout is identity in eval mode).
    h = matmul_bias_add(feat, fp["lin_w"], fp["lin_b"], pe)      # (B, D) bf16

    # TransformerEncoder sees (seq=B, batch=1, D); the size-1 batch is kept squeezed -> (B, D).
    for lp in fp["layers"]:
        h = encoder_layer(h, lp, cfg["n_heads"])

    # torch.mean(x, dim=1) averages over the size-1 transformer-batch axis -> identity squeeze.
    out = matmul_bias_act(h, fp["fc_w"], fp["fc_b"], act="sigmoid",
                          out_dtype=jnp.float32)                 # (B, n_classes) f32
    return out


# ----------------------------------------------------------------------------
# Parameter init (synthetic; shapes follow the module __init__) + one-time prep
# ----------------------------------------------------------------------------

def _normal(key, shape, scale=0.05):
    return scale * jax.random.normal(key, shape, dtype=jnp.float32)


def init_params(key, cfg):
    params = {"conv": [], "layers": []}
    in_c = cfg["in_channels"]
    for out_c in cfg["cnn_channels"]:
        key, k1, k2, k3, k4, k5, k6 = jax.random.split(key, 7)
        params["conv"].append(dict(
            w=_normal(k1, (3, 3, in_c, out_c), 0.1),
            b=_normal(k2, (out_c,)),
            gamma=1.0 + 0.1 * jax.random.normal(k3, (out_c,), jnp.float32),
            beta=_normal(k4, (out_c,)),
            mean=_normal(k5, (out_c,)),
            var=1.0 + 0.1 * jnp.abs(jax.random.normal(k6, (out_c,), jnp.float32)),
        ))
        in_c = out_c

    red = 2 ** len(cfg["cnn_channels"])
    cnn_out = (cfg["h"] // red) * (cfg["w"] // red) * cfg["cnn_channels"][-1]
    d, f = cfg["d_model"], cfg["d_ff"]

    key, k1, k2 = jax.random.split(key, 3)
    params["lin_w"] = _normal(k1, (cnn_out, d))
    params["lin_b"] = _normal(k2, (1, d))

    for _ in range(cfg["n_layers"]):
        key, *ks = jax.random.split(key, 13)
        params["layers"].append(dict(
            wqkv=_normal(ks[0], (d, 3 * d)), bqkv=_normal(ks[1], (1, 3 * d)),
            wo=_normal(ks[2], (d, d)), bo=_normal(ks[3], (1, d)),
            w1=_normal(ks[4], (d, f)), b1=_normal(ks[5], (1, f)),
            w2=_normal(ks[6], (f, d)), b2=_normal(ks[7], (1, d)),
            ln1_g=1.0 + 0.05 * jax.random.normal(ks[8], (1, d), jnp.float32),
            ln1_b=_normal(ks[9], (1, d)),
            ln2_g=1.0 + 0.05 * jax.random.normal(ks[10], (1, d), jnp.float32),
            ln2_b=_normal(ks[11], (1, d)),
        ))

    key, k1, k2 = jax.random.split(key, 3)
    params["fc_w"] = _normal(k1, (d, cfg["n_classes"]))
    params["fc_b"] = _normal(k2, (1, cfg["n_classes"]))
    return params


def prepare_params(params, eps=1e-5):
    """Fold eval-mode BatchNorm into the conv weights and pre-cast all matmul weights to bf16
    ONCE (outside the jitted forward).  Biases / LN params stay f32."""
    fp = {"conv": [], "layers": []}
    for cp in params["conv"]:
        scale = cp["gamma"] / jnp.sqrt(cp["var"] + eps)
        cin, cout = cp["w"].shape[2], cp["w"].shape[3]
        fp["conv"].append(dict(
            w_mat=(cp["w"] * scale).reshape(9 * cin, cout).astype(jnp.bfloat16),
            b_f=((cp["b"] - cp["mean"]) * scale + cp["beta"]).reshape(1, cout)
                .astype(jnp.float32),
        ))
    fp["lin_w"] = params["lin_w"].astype(jnp.bfloat16)
    fp["lin_b"] = params["lin_b"]
    for lp in params["layers"]:
        fp["layers"].append(dict(
            wqkv=lp["wqkv"].astype(jnp.bfloat16), bqkv=lp["bqkv"],
            wo=lp["wo"].astype(jnp.bfloat16), bo=lp["bo"],
            w1=lp["w1"].astype(jnp.bfloat16), b1=lp["b1"],
            w2=lp["w2"].astype(jnp.bfloat16), b2=lp["b2"],
            ln1_g=lp["ln1_g"], ln1_b=lp["ln1_b"],
            ln2_g=lp["ln2_g"], ln2_b=lp["ln2_b"],
        ))
    fp["fc_w"] = params["fc_w"].astype(jnp.bfloat16)
    fp["fc_b"] = params["fc_b"]
    return fp


# ----------------------------------------------------------------------------

if __name__ == "__main__":
    # Small, shape-consistent config (4 conv/pool stages => spatial reduced by 16x).
    cfg = dict(
        in_channels=1, h=16, w=16, batch=2,
        cnn_channels=[4, 8, 8, 16],
        d_model=64, n_heads=4, n_layers=2, d_ff=256, n_classes=2,
    )

    key = jax.random.PRNGKey(0)
    k_param, k_x = jax.random.split(key)
    params = init_params(k_param, cfg)
    fwd_params = prepare_params(params)     # BN folding + bf16 weight cast done once, outside jit
    x = jax.random.normal(k_x, (cfg["batch"], cfg["in_channels"], cfg["h"], cfg["w"]),
                          dtype=jnp.float32)

    # pe depends only on (batch, d_model): precompute/const-fold it outside the forward.
    pe = positional_encoding(cfg["batch"], cfg["d_model"])

    fwd = jax.jit(lambda xx, pp, pepe: cnn_transformer_forward(xx, pp, cfg, pepe))
    out = fwd(x, fwd_params, pe)
    out = jax.block_until_ready(out)

    assert out.shape == (cfg["batch"], cfg["n_classes"])
    assert bool(jnp.all((out >= 0.0) & (out <= 1.0)))   # sigmoid output range
    print("KERNEL_OK")
</pallas_src>

<mosaic_0001>
module attributes {stable_mosaic.version = 11 : i64} {
  func.func @_conv_pool_kernel(%arg0: i32, %arg1: memref<4x128x9xbf16, #tpu.memory_space<vmem>>, %arg2: memref<9x4xbf16, #tpu.memory_space<vmem>>, %arg3: memref<1x4xf32, #tpu.memory_space<vmem>>, %arg4: memref<128x4xbf16, #tpu.memory_space<vmem>>) attributes {dimension_semantics = [#tpu.dimension_semantics<parallel>], iteration_bounds = array<i64: 1>, scalar_prefetch = 0 : i64, scratch_operands = 0 : i64, tpu.core_type = #tpu.core_type<tc>, window_params = [{transform_indices = @transform_0, window_bounds = array<i64: 4, 128, 9>}, {pipeline_mode = #tpu.pipeline_mode<synchronous>, transform_indices = @transform_1, window_bounds = array<i64: 9, 4>}, {pipeline_mode = #tpu.pipeline_mode<synchronous>, transform_indices = @transform_2, window_bounds = array<i64: 1, 4>}, {transform_indices = @transform_3, window_bounds = array<i64: 128, 4>}]} {
    %c0 = arith.constant 0 : index
    %c0_0 = arith.constant 0 : index
    %c0_1 = arith.constant 0 : index
    %0 = vector.load %arg1[%c0, %c0_0, %c0_1] : memref<4x128x9xbf16, #tpu.memory_space<vmem>>, vector<4x128x9xbf16>
    %1 = vector.shape_cast %0 : vector<4x128x9xbf16> to vector<512x9xbf16>
    %c0_2 = arith.constant 0 : index
    %c0_3 = arith.constant 0 : index
    %2 = vector.load %arg2[%c0_2, %c0_3] : memref<9x4xbf16, #tpu.memory_space<vmem>>, vector<9x4xbf16>
    %cst = arith.constant dense<0.000000e+00> : vector<512x4xf32>
    %3 = tpu.matmul %1, %2, %cst {dimension_numbers = #tpu.dot_dimension_numbers<[1], [0], [0], [1], [0, 0, 1, 1], [], []>} : vector<512x9xbf16>, vector<9x4xbf16>, vector<512x4xf32> -> vector<512x4xf32>
    %4 = vector.shape_cast %3 : vector<512x4xf32> to vector<4x128x4xf32>
    %cst_4 = arith.constant dense<0xFF800000> : vector<128x4xf32>
    %5 = vector.multi_reduction <maximumf>, %4, %cst_4 [0] : vector<4x128x4xf32> to vector<128x4xf32>
    %c0_5 = arith.constant 0 : index
    %c0_6 = arith.constant 0 : index
    %6 = vector.load %arg3[%c0_5, %c0_6] : memref<1x4xf32, #tpu.memory_space<vmem>>, vector<1x4xf32>
    %7 = vector.broadcast %6 : vector<1x4xf32> to vector<128x4xf32>
    %8 = arith.addf %5, %7 : vector<128x4xf32>
    %cst_7 = arith.constant 0.000000e+00 : f32
    %9 = vector.broadcast %cst_7 : f32 to vector<128x4xf32>
    %10 = arith.maximumf %8, %9 : vector<128x4xf32>
    %11 = arith.truncf %10 : vector<128x4xf32> to vector<128x4xbf16>
    %c0_8 = arith.constant 0 : index
    %c0_9 = arith.constant 0 : index
    %12 = vector.load %arg4[%c0_8, %c0_9] : memref<128x4xbf16, #tpu.memory_space<vmem>>, vector<128x4xbf16>
    tpu.vector_store %arg4[%c0_8, %c0_9], %11 {strides = array<i32>} : memref<128x4xbf16, #tpu.memory_space<vmem>>, vector<128x4xbf16>,
    return
  }
  func.func @transform_0(%arg0: i32) -> (i32, i32, i32) {
    %c0_i32 = arith.constant 0 : i32
    %c0_i32_0 = arith.constant 0 : i32
    %c0_i32_1 = arith.constant 0 : i32
    return %c0_i32, %arg0, %c0_i32_0 : i32, i32, i32
  }
  func.func @transform_1(%arg0: i32) -> (i32, i32) {
    %c0_i32 = arith.constant 0 : i32
    %c0_i32_0 = arith.constant 0 : i32
    %c0_i32_1 = arith.constant 0 : i32
    return %c0_i32, %c0_i32_0 : i32, i32
  }
  func.func @transform_2(%arg0: i32) -> (i32, i32) {
    %c0_i32 = arith.constant 0 : i32
    %c0_i32_0 = arith.constant 0 : i32
    %c0_i32_1 = arith.constant 0 : i32
    return %c0_i32, %c0_i32_0 : i32, i32
  }
  func.func @transform_3(%arg0: i32) -> (i32, i32) {
    %c0_i32 = arith.constant 0 : i32
    %c0_i32_0 = arith.constant 0 : i32
    return %arg0, %c0_i32 : i32, i32
  }
}

module attributes {stable_mosaic.version = 11 : i64} {
  func.func @_conv_pool_kernel(%arg0: i32, %arg1: memref<4x32x36xbf16, #tpu.memory_space<vmem>>, %arg2: memref<36x8xbf16, #tpu.memory_space<vmem>>, %arg3: memref<1x8xf32, #tpu.memory_space<vmem>>, %arg4: memref<32x8xbf16, #tpu.memory_space<vmem>>) attributes {dimension_semantics = [#tpu.dimension_semantics<parallel>], iteration_bounds = array<i64: 1>, scalar_prefetch = 0 : i64, scratch_operands = 0 : i64, tpu.core_type = #tpu.core_type<tc>, window_params = [{transform_indices = @transform_0, window_bounds = array<i64: 4, 32, 36>}, {pipeline_mode = #tpu.pipeline_mode<synchronous>, transform_indices = @transform_1, window_bounds = array<i64: 36, 8>}, {pipeline_mode = #tpu.pipeline_mode<synchronous>, transform_indices = @transform_2, window_bounds = array<i64: 1, 8>}, {transform_indices = @transform_3, window_bounds = array<i64: 32, 8>}]} {
    %c0 = arith.constant 0 : index
    %c0_0 = arith.constant 0 : index
    %c0_1 = arith.constant 0 : index
    %0 = vector.load %arg1[%c0, %c0_0, %c0_1] : memref<4x32x36xbf16, #tpu.memory_space<vmem>>, vector<4x32x36xbf16>
    %1 = vector.shape_cast %0 : vector<4x32x36xbf16> to vector<128x36xbf16>
    %c0_2 = arith.constant 0 : index
    %c0_3 = arith.constant 0 : index
    %2 = vector.load %arg2[%c0_2, %c0_3] : memref<36x8xbf16, #tpu.memory_space<vmem>>, vector<36x8xbf16>
    %cst = arith.constant dense<0.000000e+00> : vector<128x8xf32>
    %3 = tpu.matmul %1, %2, %cst {dimension_numbers = #tpu.dot_dimension_numbers<[1], [0], [0], [1], [0, 0, 1, 1], [], []>} : vector<128x36xbf16>, vector<36x8xbf16>, vector<128x8xf32> -> vector<128x8xf32>
    %4 = vector.shape_cast %3 : vector<128x8xf32> to vector<4x32x8xf32>
    %cst_4 = arith.constant dense<0xFF800000> : vector<32x8xf32>
    %5 = vector.multi_reduction <maximumf>, %4, %cst_4 [0] : vector<4x32x8xf32> to vector<32x8xf32>
    %c0_5 = arith.constant 0 : index
    %c0_6 = arith.constant 0 : index
    %6 = vector.load %arg3[%c0_5, %c0_6] : memref<1x8xf32, #tpu.memory_space<vmem>>, vector<1x8xf32>
    %7 = vector.broadcast %6 : vector<1x8xf32> to vector<32x8xf32>
    %8 = arith.addf %5, %7 : vector<32x8xf32>
    %cst_7 = arith.constant 0.000000e+00 : f32
    %9 = vector.broadcast %cst_7 : f32 to vector<32x8xf32>
    %10 = arith.maximumf %8, %9 : vector<32x8xf32>
    %11 = arith.truncf %10 : vector<32x8xf32> to vector<32x8xbf16>
    %c0_8 = arith.constant 0 : index
    %c0_9 = arith.constant 0 : index
    %12 = vector.load %arg4[%c0_8, %c0_9] : memref<32x8xbf16, #tpu.memory_space<vmem>>, vector<32x8xbf16>
    tpu.vector_store %arg4[%c0_8, %c0_9], %11 {strides = array<i32>} : memref<32x8xbf16, #tpu.memory_space<vmem>>, vector<32x8xbf16>,
    return
  }
  func.func @transform_0(%arg0: i32) -> (i32, i32, i32) {
    %c0_i32 = arith.constant 0 : i32
    %c0_i32_0 = arith.constant 0 : i32
    %c0_i32_1 = arith.constant 0 : i32
    return %c0_i32, %arg0, %c0_i32_0 : i32, i32, i32
  }
  func.func @transform_1(%arg0: i32) -> (i32, i32) {
    %c0_i32 = arith.constant 0 : i32
    %c0_i32_0 = arith.constant 0 : i32
    %c0_i32_1 = arith.constant 0 : i32
    return %c0_i32, %c0_i32_0 : i32, i32
  }
  func.func @transform_2(%arg0: i32) -> (i32, i32) {
    %c0_i32 = arith.constant 0 : i32
    %c0_i32_0 = arith.constant 0 : i32
    %c0_i32_1 = arith.constant 0 : i32
    return %c0_i32, %c0_i32_0 : i32, i32
  }
  func.func @transform_3(%arg0: i32) -> (i32, i32) {
    %c0_i32 = arith.constant 0 : i32
    %c0_i32_0 = arith.constant 0 : i32
    return %arg0, %c0_i32 : i32, i32
  }
}

module attributes {stable_mosaic.version = 11 : i64} {
  func.func @_conv_pool_kernel(%arg0: i32, %arg1: memref<4x8x72xbf16, #tpu.memory_space<vmem>>, %arg2: memref<72x8xbf16, #tpu.memory_space<vmem>>, %arg3: memref<1x8xf32, #tpu.memory_space<vmem>>, %arg4: memref<8x8xbf16, #tpu.memory_space<vmem>>) attributes {dimension_semantics = [#tpu.dimension_semantics<parallel>], iteration_bounds = array<i64: 1>, scalar_prefetch = 0 : i64, scratch_operands = 0 : i64, tpu.core_type = #tpu.core_type<tc>, window_params = [{transform_indices = @transform_0, window_bounds = array<i64: 4, 8, 72>}, {pipeline_mode = #tpu.pipeline_mode<synchronous>, transform_indices = @transform_1, window_bounds = array<i64: 72, 8>}, {pipeline_mode = #tpu.pipeline_mode<synchronous>, transform_indices = @transform_2, window_bounds = array<i64: 1, 8>}, {transform_indices = @transform_3, window_bounds = array<i64: 8, 8>}]} {
    %c0 = arith.constant 0 : index
    %c0_0 = arith.constant 0 : index
    %c0_1 = arith.constant 0 : index
    %0 = vector.load %arg1[%c0, %c0_0, %c0_1] : memref<4x8x72xbf16, #tpu.memory_space<vmem>>, vector<4x8x72xbf16>
    %1 = vector.shape_cast %0 : vector<4x8x72xbf16> to vector<32x72xbf16>
    %c0_2 = arith.constant 0 : index
    %c0_3 = arith.constant 0 : index
    %2 = vector.load %arg2[%c0_2, %c0_3] : memref<72x8xbf16, #tpu.memory_space<vmem>>, vector<72x8xbf16>
    %cst = arith.constant dense<0.000000e+00> : vector<32x8xf32>
    %3 = tpu.matmul %1, %2, %cst {dimension_numbers = #tpu.dot_dimension_numbers<[1], [0], [0], [1], [0, 0, 1, 1], [], []>} : vector<32x72xbf16>, vector<72x8xbf16>, vector<32x8xf32> -> vector<32x8xf32>
    %4 = vector.shape_cast %3 : vector<32x8xf32> to vector<4x8x8xf32>
    %cst_4 = arith.constant dense<0xFF800000> : vector<8x8xf32>
    %5 = vector.multi_reduction <maximumf>, %4, %cst_4 [0] : vector<4x8x8xf32> to vector<8x8xf32>
    %c0_5 = arith.constant 0 : index
    %c0_6 = arith.constant 0 : index
    %6 = vector.load %arg3[%c0_5, %c0_6] : memref<1x8xf32, #tpu.memory_space<vmem>>, vector<1x8xf32>
    %7 = vector.broadcast %6 : vector<1x8xf32> to vector<8x8xf32>
    %8 = arith.addf %5, %7 : vector<8x8xf32>
    %cst_7 = arith.constant 0.000000e+00 : f32
    %9 = vector.broadcast %cst_7 : f32 to vector<8x8xf32>
    %10 = arith.maximumf %8, %9 : vector<8x8xf32>
    %11 = arith.truncf %10 : vector<8x8xf32> to vector<8x8xbf16>
    %c0_8 = arith.constant 0 : index
    %c0_9 = arith.constant 0 : index
    %12 = vector.load %arg4[%c0_8, %c0_9] : memref<8x8xbf16, #tpu.memory_space<vmem>>, vector<8x8xbf16>
    tpu.vector_store %arg4[%c0_8, %c0_9], %11 {strides = array<i32>} : memref<8x8xbf16, #tpu.memory_space<vmem>>, vector<8x8xbf16>,
    return
  }
  func.func @transform_0(%arg0: i32) -> (i32, i32, i32) {
    %c0_i32 = arith.constant 0 : i32
    %c0_i32_0 = arith.constant 0 : i32
    %c0_i32_1 = arith.constant 0 : i32
    return %c0_i32, %arg0, %c0_i32_0 : i32, i32, i32
  }
  func.func @transform_1(%arg0: i32) -> (i32, i32) {
    %c0_i32 = arith.constant 0 : i32
    %c0_i32_0 = arith.constant 0 : i32
    %c0_i32_1 = arith.constant 0 : i32
    return %c0_i32, %c0_i32_0 : i32, i32
  }
  func.func @transform_2(%arg0: i32) -> (i32, i32) {
    %c0_i32 = arith.constant 0 : i32
    %c0_i32_0 = arith.constant 0 : i32
    %c0_i32_1 = arith.constant 0 : i32
    return %c0_i32, %c0_i32_0 : i32, i32
  }
  func.func @transform_3(%arg0: i32) -> (i32, i32) {
    %c0_i32 = arith.constant 0 : i32
    %c0_i32_0 = arith.constant 0 : i32
    return %arg0, %c0_i32 : i32, i32
  }
}

module attributes {stable_mosaic.version = 11 : i64} {
  func.func @_conv_pool_kernel(%arg0: i32, %arg1: memref<4x2x72xbf16, #tpu.memory_space<vmem>>, %arg2: memref<72x16xbf16, #tpu.memory_space<vmem>>, %arg3: memref<1x16xf32, #tpu.memory_space<vmem>>, %arg4: memref<2x16xbf16, #tpu.memory_space<vmem>>) attributes {dimension_semantics = [#tpu.dimension_semantics<parallel>], iteration_bounds = array<i64: 1>, scalar_prefetch = 0 : i64, scratch_operands = 0 : i64, tpu.core_type = #tpu.core_type<tc>, window_params = [{transform_indices = @transform_0, window_bounds = array<i64: 4, 2, 72>}, {pipeline_mode = #tpu.pipeline_mode<synchronous>, transform_indices = @transform_1, window_bounds = array<i64: 72, 16>}, {pipeline_mode = #tpu.pipeline_mode<synchronous>, transform_indices = @transform_2, window_bounds = array<i64: 1, 16>}, {transform_indices = @transform_3, window_bounds = array<i64: 2, 16>}]} {
    %c0 = arith.constant 0 : index
    %c0_0 = arith.constant 0 : index
    %c0_1 = arith.constant 0 : index
    %0 = vector.load %arg1[%c0, %c0_0, %c0_1] : memref<4x2x72xbf16, #tpu.memory_space<vmem>>, vector<4x2x72xbf16>
    %1 = vector.shape_cast %0 : vector<4x2x72xbf16> to vector<8x72xbf16>
    %c0_2 = arith.constant 0 : index
    %c0_3 = arith.constant 0 : index
    %2 = vector.load %arg2[%c0_2, %c0_3] : memref<72x16xbf16, #tpu.memory_space<vmem>>, vector<72x16xbf16>
    %cst = arith.constant dense<0.000000e+00> : vector<8x16xf32>
    %3 = tpu.matmul %1, %2, %cst {dimension_numbers = #tpu.dot_dimension_numbers<[1], [0], [0], [1], [0, 0, 1, 1], [], []>} : vector<8x72xbf16>, vector<72x16xbf16>, vector<8x16xf32> -> vector<8x16xf32>
    %4 = vector.shape_cast %3 : vector<8x16xf32> to vector<4x2x16xf32>
    %cst_4 = arith.constant dense<0xFF800000> : vector<2x16xf32>
    %5 = vector.multi_reduction <maximumf>, %4, %cst_4 [0] : vector<4x2x16xf32> to vector<2x16xf32>
    %c0_5 = arith.constant 0 : index
    %c0_6 = arith.constant 0 : index
    %6 = vector.load %arg3[%c0_5, %c0_6] : memref<1x16xf32, #tpu.memory_space<vmem>>, vector<1x16xf32>
    %7 = vector.broadcast %6 : vector<1x16xf32> to vector<2x16xf32>
    %8 = arith.addf %5, %7 : vector<2x16xf32>
    %cst_7 = arith.constant 0.000000e+00 : f32
    %9 = vector.broadcast %cst_7 : f32 to vector<2x16xf32>
    %10 = arith.maximumf %8, %9 : vector<2x16xf32>
    %11 = arith.truncf %10 : vector<2x16xf32> to vector<2x16xbf16>
    %c0_8 = arith.constant 0 : index
    %c0_9 = arith.constant 0 : index
    %12 = vector.load %arg4[%c0_8, %c0_9] : memref<2x16xbf16, #tpu.memory_space<vmem>>, vector<2x16xbf16>
    tpu.vector_store %arg4[%c0_8, %c0_9], %11 {strides = array<i32>} : memref<2x16xbf16, #tpu.memory_space<vmem>>, vector<2x16xbf16>,
    return
  }
  func.func @transform_0(%arg0: i32) -> (i32, i32, i32) {
    %c0_i32 = arith.constant 0 : i32
    %c0_i32_0 = arith.constant 0 : i32
    %c0_i32_1 = arith.constant 0 : i32
    return %c0_i32, %arg0, %c0_i32_0 : i32, i32, i32
  }
  func.func @transform_1(%arg0: i32) -> (i32, i32) {
    %c0_i32 = arith.constant 0 : i32
    %c0_i32_0 = arith.constant 0 : i32
    %c0_i32_1 = arith.constant 0 : i32
    return %c0_i32, %c0_i32_0 : i32, i32
  }
  func.func @transform_2(%arg0: i32) -> (i32, i32) {
    %c0_i32 = arith.constant 0 : i32
    %c0_i32_0 = arith.constant 0 : i32
    %c0_i32_1 = arith.constant 0 : i32
    return %c0_i32, %c0_i32_0 : i32, i32
  }
  func.func @transform_3(%arg0: i32) -> (i32, i32) {
    %c0_i32 = arith.constant 0 : i32
    %c0_i32_0 = arith.constant 0 : i32
    return %arg0, %c0_i32 : i32, i32
  }
}

module attributes {stable_mosaic.version = 11 : i64} {
  func.func @_mm_add_kernel(%arg0: i32, %arg1: memref<2x16xbf16, #tpu.memory_space<vmem>>, %arg2: memref<16x64xbf16, #tpu.memory_space<vmem>>, %arg3: memref<1x64xf32, #tpu.memory_space<vmem>>, %arg4: memref<2x64xf32, #tpu.memory_space<vmem>>, %arg5: memref<2x64xbf16, #tpu.memory_space<vmem>>) attributes {dimension_semantics = [#tpu.dimension_semantics<parallel>], iteration_bounds = array<i64: 1>, scalar_prefetch = 0 : i64, scratch_operands = 0 : i64, tpu.core_type = #tpu.core_type<tc>, window_params = [{transform_indices = @transform_0, window_bounds = array<i64: 2, 16>}, {pipeline_mode = #tpu.pipeline_mode<synchronous>, transform_indices = @transform_1, window_bounds = array<i64: 16, 64>}, {pipeline_mode = #tpu.pipeline_mode<synchronous>, transform_indices = @transform_2, window_bounds = array<i64: 1, 64>}, {transform_indices = @transform_3, window_bounds = array<i64: 2, 64>}, {transform_indices = @transform_4, window_bounds = array<i64: 2, 64>}]} {
    %c0 = arith.constant 0 : index
    %c0_0 = arith.constant 0 : index
    %0 = vector.load %arg1[%c0, %c0_0] : memref<2x16xbf16, #tpu.memory_space<vmem>>, vector<2x16xbf16>
    %c0_1 = arith.constant 0 : index
    %c0_2 = arith.constant 0 : index
    %1 = vector.load %arg2[%c0_1, %c0_2] : memref<16x64xbf16, #tpu.memory_space<vmem>>, vector<16x64xbf16>
    %cst = arith.constant dense<0.000000e+00> : vector<2x64xf32>
    %2 = tpu.matmul %0, %1, %cst {dimension_numbers = #tpu.dot_dimension_numbers<[1], [0], [0], [1], [0, 0, 1, 1], [], []>} : vector<2x16xbf16>, vector<16x64xbf16>, vector<2x64xf32> -> vector<2x64xf32>
    %c0_3 = arith.constant 0 : index
    %c0_4 = arith.constant 0 : index
    %3 = vector.load %arg3[%c0_3, %c0_4] : memref<1x64xf32, #tpu.memory_space<vmem>>, vector<1x64xf32>
    %4 = vector.broadcast %3 : vector<1x64xf32> to vector<2x64xf32>
    %5 = arith.addf %2, %4 : vector<2x64xf32>
    %c0_5 = arith.constant 0 : index
    %c0_6 = arith.constant 0 : index
    %6 = vector.load %arg4[%c0_5, %c0_6] : memref<2x64xf32, #tpu.memory_space<vmem>>, vector<2x64xf32>
    %7 = arith.addf %5, %6 : vector<2x64xf32>
    %8 = arith.truncf %7 : vector<2x64xf32> to vector<2x64xbf16>
    %c0_7 = arith.constant 0 : index
    %c0_8 = arith.constant 0 : index
    %9 = vector.load %arg5[%c0_7, %c0_8] : memref<2x64xbf16, #tpu.memory_space<vmem>>, vector<2x64xbf16>
    tpu.vector_store %arg5[%c0_7, %c0_8], %8 {strides = array<i32>} : memref<2x64xbf16, #tpu.memory_space<vmem>>, vector<2x64xbf16>,
    return
  }
  func.func @transform_0(%arg0: i32) -> (i32, i32) {
    %c0_i32 = arith.constant 0 : i32
    %c0_i32_0 = arith.constant 0 : i32
    return %arg0, %c0_i32 : i32, i32
  }
  func.func @transform_1(%arg0: i32) -> (i32, i32) {
    %c0_i32 = arith.constant 0 : i32
    %c0_i32_0 = arith.constant 0 : i32
    %c0_i32_1 = arith.constant 0 : i32
    return %c0_i32, %c0_i32_0 : i32, i32
  }
  func.func @transform_2(%arg0: i32) -> (i32, i32) {
    %c0_i32 = arith.constant 0 : i32
    %c0_i32_0 = arith.constant 0 : i32
    %c0_i32_1 = arith.constant 0 : i32
    return %c0_i32, %c0_i32_0 : i32, i32
  }
  func.func @transform_3(%arg0: i32) -> (i32, i32) {
    %c0_i32 = arith.constant 0 : i32
    %c0_i32_0 = arith.constant 0 : i32
    return %arg0, %c0_i32 : i32, i32
  }
  func.func @transform_4(%arg0: i32) -> (i32, i32) {
    %c0_i32 = arith.constant 0 : i32
    %c0_i32_0 = arith.constant 0 : i32
    return %arg0, %c0_i32 : i32, i32
  }
}

module attributes {stable_mosaic.version = 11 : i64} {
  func.func @_attn_block_kernel(%arg0: i32, %arg1: memref<2x64xbf16, #tpu.memory_space<vmem>>, %arg2: memref<64x192xbf16, #tpu.memory_space<vmem>>, %arg3: memref<1x192xf32, #tpu.memory_space<vmem>>, %arg4: memref<64x64xbf16, #tpu.memory_space<vmem>>, %arg5: memref<1x64xf32, #tpu.memory_space<vmem>>, %arg6: memref<1x64xf32, #tpu.memory_space<vmem>>, %arg7: memref<1x64xf32, #tpu.memory_space<vmem>>, %arg8: memref<2x64xbf16, #tpu.memory_space<vmem>>) attributes {dimension_semantics = [#tpu.dimension_semantics<arbitrary>], iteration_bounds = array<i64: 1>, scalar_prefetch = 0 : i64, scratch_operands = 0 : i64, tpu.core_type = #tpu.core_type<tc>, window_params = [{pipeline_mode = #tpu.pipeline_mode<synchronous>, transform_indices = @transform_0, window_bounds = array<i64: 2, 64>}, {pipeline_mode = #tpu.pipeline_mode<synchronous>, transform_indices = @transform_1, window_bounds = array<i64: 64, 192>}, {pipeline_mode = #tpu.pipeline_mode<synchronous>, transform_indices = @transform_2, window_bounds = array<i64: 1, 192>}, {pipeline_mode = #tpu.pipeline_mode<synchronous>, transform_indices = @transform_3, window_bounds = array<i64: 64, 64>}, {pipeline_mode = #tpu.pipeline_mode<synchronous>, transform_indices = @transform_4, window_bounds = array<i64: 1, 64>}, {pipeline_mode = #tpu.pipeline_mode<synchronous>, transform_indices = @transform_5, window_bounds = array<i64: 1, 64>}, {pipeline_mode = #tpu.pipeline_mode<synchronous>, transform_indices = @transform_6, window_bounds = array<i64: 1, 64>}, {pipeline_mode = #tpu.pipeline_mode<synchronous>, transform_indices = @transform_7, window_bounds = array<i64: 2, 64>}]} {
    %c0 = arith.constant 0 : index
    %c0_0 = arith.constant 0 : index
    %0 = vector.load %arg1[%c0, %c0_0] : memref<2x64xbf16, #tpu.memory_space<vmem>>, vector<2x64xbf16>
    %c0_1 = arith.constant 0 : index
    %c0_2 = arith.constant 0 : index
    %1 = vector.load %arg2[%c0_1, %c0_2] : memref<64x192xbf16, #tpu.memory_space<vmem>>, vector<64x192xbf16>
    %cst = arith.constant dense<0.000000e+00> : vector<2x192xf32>
    %2 = tpu.matmul %0, %1, %cst {dimension_numbers = #tpu.dot_dimension_numbers<[1], [0], [0], [1], [0, 0, 1, 1], [], []>} : vector<2x64xbf16>, vector<64x192xbf16>, vector<2x192xf32> -> vector<2x192xf32>
    %c0_3 = arith.constant 0 : index
    %c0_4 = arith.constant 0 : index
    %3 = vector.load %arg3[%c0_3, %c0_4] : memref<1x192xf32, #tpu.memory_space<vmem>>, vector<1x192xf32>
    %4 = vector.broadcast %3 : vector<1x192xf32> to vector<2x192xf32>
    %5 = arith.addf %2, %4 : vector<2x192xf32>
    %6 = arith.truncf %5 : vector<2x192xf32> to vector<2x192xbf16>
    %7 = vector.extract_strided_slice %6 {offsets = [0, 0], sizes = [2, 16], strides = [1, 1]} : vector<2x192xbf16> to vector<2x16xbf16>
    %8 = vector.extract_strided_slice %6 {offsets = [0, 64], sizes = [2, 16], strides = [1, 1]} : vector<2x192xbf16> to vector<2x16xbf16>
    %9 = vector.extract_strided_slice %6 {offsets = [0, 128], sizes = [2, 16], strides = [1, 1]} : vector<2x192xbf16> to vector<2x16xbf16>
    %cst_5 = arith.constant dense<0.000000e+00> : vector<2x2xf32>
    %10 = tpu.matmul %7, %8, %cst_5 {dimension_numbers = #tpu.dot_dimension_numbers<[1], [1], [0], [0], [0, 0, 1, 0], [], []>} : vector<2x16xbf16>, vector<2x16xbf16>, vector<2x2xf32> -> vector<2x2xf32>
    %cst_6 = arith.constant 2.500000e-01 : f32
    %11 = vector.broadcast %cst_6 : f32 to vector<2x2xf32>
    %12 = arith.mulf %10, %11 : vector<2x2xf32>
    %cst_7 = arith.constant dense<0xFF800000> : vector<2xf32>
    %13 = vector.multi_reduction <maximumf>, %12, %cst_7 [1] : vector<2x2xf32> to vector<2xf32>
    %14 = vector.shape_cast %13 : vector<2xf32> to vector<2x1xf32>
    %15 = vector.broadcast %14 : vector<2x1xf32> to vector<2x2xf32>
    %16 = arith.subf %12, %15 : vector<2x2xf32>
    %17 = math.exp %16 : vector<2x2xf32>
    %cst_8 = arith.constant dense<0.000000e+00> : vector<2xf32>
    %18 = vector.multi_reduction <add>, %17, %cst_8 [1] : vector<2x2xf32> to vector<2xf32>
    %19 = vector.shape_cast %18 : vector<2xf32> to vector<2x1xf32>
    %20 = tpu.reciprocal %19 {approx = true} : vector<2x1xf32> -> vector<2x1xf32>
    %21 = vector.broadcast %20 : vector<2x1xf32> to vector<2x2xf32>
    %22 = arith.mulf %17, %21 : vector<2x2xf32>
    %23 = arith.truncf %22 : vector<2x2xf32> to vector<2x2xbf16>
    %cst_9 = arith.constant dense<0.000000e+00> : vector<2x16xf32>
    %24 = tpu.matmul %23, %9, %cst_9 {dimension_numbers = #tpu.dot_dimension_numbers<[1], [0], [0], [1], [0, 0, 1, 1], [], []>} : vector<2x2xbf16>, vector<2x16xbf16>, vector<2x16xf32> -> vector<2x16xf32>
    %25 = vector.extract_strided_slice %6 {offsets = [0, 16], sizes = [2, 16], strides = [1, 1]} : vector<2x192xbf16> to vector<2x16xbf16>
    %26 = vector.extract_strided_slice %6 {offsets = [0, 80], sizes = [2, 16], strides = [1, 1]} : vector<2x192xbf16> to vector<2x16xbf16>
    %27 = vector.extract_strided_slice %6 {offsets = [0, 144], sizes = [2, 16], strides = [1, 1]} : vector<2x192xbf16> to vector<2x16xbf16>
    %cst_10 = arith.constant dense<0.000000e+00> : vector<2x2xf32>
    %28 = tpu.matmul %25, %26, %cst_10 {dimension_numbers = #tpu.dot_dimension_numbers<[1], [1], [0], [0], [0, 0, 1, 0], [], []>} : vector<2x16xbf16>, vector<2x16xbf16>, vector<2x2xf32> -> vector<2x2xf32>
    %cst_11 = arith.constant 2.500000e-01 : f32
    %29 = vector.broadcast %cst_11 : f32 to vector<2x2xf32>
    %30 = arith.mulf %28, %29 : vector<2x2xf32>
    %cst_12 = arith.constant dense<0xFF800000> : vector<2xf32>
    %31 = vector.multi_reduction <maximumf>, %30, %cst_12 [1] : vector<2x2xf32> to vector<2xf32>
    %32 = vector.shape_cast %31 : vector<2xf32> to vector<2x1xf32>
    %33 = vector.broadcast %32 : vector<2x1xf32> to vector<2x2xf32>
    %34 = arith.subf %30, %33 : vector<2x2xf32>
    %35 = math.exp %34 : vector<2x2xf32>
    %cst_13 = arith.constant dense<0.000000e+00> : vector<2xf32>
    %36 = vector.multi_reduction <add>, %35, %cst_13 [1] : vector<2x2xf32> to vector<2xf32>
    %37 = vector.shape_cast %36 : vector<2xf32> to vector<2x1xf32>
    %38 = tpu.reciprocal %37 {approx = true} : vector<2x1xf32> -> vector<2x1xf32>
    %39 = vector.broadcast %38 : vector<2x1xf32> to vector<2x2xf32>
    %40 = arith.mulf %35, %39 : vector<2x2xf32>
    %41 = arith.truncf %40 : vector<2x2xf32> to vector<2x2xbf16>
    %cst_14 = arith.constant dense<0.000000e+00> : vector<2x16xf32>
    %42 = tpu.matmul %41, %27, %cst_14 {dimension_numbers = #tpu.dot_dimension_numbers<[1], [0], [0], [1], [0, 0, 1, 1], [], []>} : vector<2x2xbf16>, vector<2x16xbf16>, vector<2x16xf32> -> vector<2x16xf32>
    %43 = vector.extract_strided_slice %6 {offsets = [0, 32], sizes = [2, 16], strides = [1, 1]} : vector<2x192xbf16> to vector<2x16xbf16>
    %44 = vector.extract_strided_slice %6 {offsets = [0, 96], sizes = [2, 16], strides = [1, 1]} : vector<2x192xbf16> to vector<2x16xbf16>
    %45 = vector.extract_strided_slice %6 {offsets = [0, 160], sizes = [2, 16], strides = [1, 1]} : vector<2x192xbf16> to vector<2x16xbf16>
    %cst_15 = arith.constant dense<0.000000e+00> : vector<2x2xf32>
    %46 = tpu.matmul %43, %44, %cst_15 {dimension_numbers = #tpu.dot_dimension_numbers<[1], [1], [0], [0], [0, 0, 1, 0], [], []>} : vector<2x16xbf16>, vector<2x16xbf16>, vector<2x2xf32> -> vector<2x2xf32>
    %cst_16 = arith.constant 2.500000e-01 : f32
    %47 = vector.broadcast %cst_16 : f32 to vector<2x2xf32>
    %48 = arith.mulf %46, %47 : vector<2x2xf32>
    %cst_17 = arith.constant dense<0xFF800000> : vector<2xf32>
    %49 = vector.multi_reduction <maximumf>, %48, %cst_17 [1] : vector<2x2xf32> to vector<2xf32>
    %50 = vector.shape_cast %49 : vector<2xf32> to vector<2x1xf32>
    %51 = vector.broadcast %50 : vector<2x1xf32> to vector<2x2xf32>
    %52 = arith.subf %48, %51 : vector<2x2xf32>
    %53 = math.exp %52 : vector<2x2xf32>
    %cst_18 = arith.constant dense<0.000000e+00> : vector<2xf32>
    %54 = vector.multi_reduction <add>, %53, %cst_18 [1] : vector<2x2xf32> to vector<2xf32>
    %55 = vector.shape_cast %54 : vector<2xf32> to vector<2x1xf32>
    %56 = tpu.reciprocal %55 {approx = true} : vector<2x1xf32> -> vector<2x1xf32>
    %57 = vector.broadcast %56 : vector<2x1xf32> to vector<2x2xf32>
    %58 = arith.mulf %53, %57 : vector<2x2xf32>
    %59 = arith.truncf %58 : vector<2x2xf32> to vector<2x2xbf16>
    %cst_19 = arith.constant dense<0.000000e+00> : vector<2x16xf32>
    %60 = tpu.matmul %59, %45, %cst_19 {dimension_numbers = #tpu.dot_dimension_numbers<[1], [0], [0], [1], [0, 0, 1, 1], [], []>} : vector<2x2xbf16>, vector<2x16xbf16>, vector<2x16xf32> -> vector<2x16xf32>
    %61 = vector.extract_strided_slice %6 {offsets = [0, 48], sizes = [2, 16], strides = [1, 1]} : vector<2x192xbf16> to vector<2x16xbf16>
    %62 = vector.extract_strided_slice %6 {offsets = [0, 112], sizes = [2, 16], strides = [1, 1]} : vector<2x192xbf16> to vector<2x16xbf16>
    %63 = vector.extract_strided_slice %6 {offsets = [0, 176], sizes = [2, 16], strides = [1, 1]} : vector<2x192xbf16> to vector<2x16xbf16>
    %cst_20 = arith.constant dense<0.000000e+00> : vector<2x2xf32>
    %64 = tpu.matmul %61, %62, %cst_20 {dimension_numbers = #tpu.dot_dimension_numbers<[1], [1], [0], [0], [0, 0, 1, 0], [], []>} : vector<2x16xbf16>, vector<2x16xbf16>, vector<2x2xf32> -> vector<2x2xf32>
    %cst_21 = arith.constant 2.500000e-01 : f32
    %65 = vector.broadcast %cst_21 : f32 to vector<2x2xf32>
    %66 = arith.mulf %64, %65 : vector<2x2xf32>
    %cst_22 = arith.constant dense<0xFF800000> : vector<2xf32>
    %67 = vector.multi_reduction <maximumf>, %66, %cst_22 [1] : vector<2x2xf32> to vector<2xf32>
    %68 = vector.shape_cast %67 : vector<2xf32> to vector<2x1xf32>
    %69 = vector.broadcast %68 : vector<2x1xf32> to vector<2x2xf32>
    %70 = arith.subf %66, %69 : vector<2x2xf32>
    %71 = math.exp %70 : vector<2x2xf32>
    %cst_23 = arith.constant dense<0.000000e+00> : vector<2xf32>
    %72 = vector.multi_reduction <add>, %71, %cst_23 [1] : vector<2x2xf32> to vector<2xf32>
    %73 = vector.shape_cast %72 : vector<2xf32> to vector<2x1xf32>
    %74 = tpu.reciprocal %73 {approx = true} : vector<2x1xf32> -> vector<2x1xf32>
    %75 = vector.broadcast %74 : vector<2x1xf32> to vector<2x2xf32>
    %76 = arith.mulf %71, %75 : vector<2x2xf32>
    %77 = arith.truncf %76 : vector<2x2xf32> to vector<2x2xbf16>
    %cst_24 = arith.constant dense<0.000000e+00> : vector<2x16xf32>
    %78 = tpu.matmul %77, %63, %cst_24 {dimension_numbers = #tpu.dot_dimension_numbers<[1], [0], [0], [1], [0, 0, 1, 1], [], []>} : vector<2x2xbf16>, vector<2x16xbf16>, vector<2x16xf32> -> vector<2x16xf32>
    %79 = tpu.concatenate %24, %42, %60, %78 in 1 : vector<2x16xf32>, vector<2x16xf32>, vector<2x16xf32>, vector<2x16xf32> -> vector<2x64xf32>
    %80 = arith.truncf %79 : vector<2x64xf32> to vector<2x64xbf16>
    %c0_25 = arith.constant 0 : index
    %c0_26 = arith.constant 0 : index
    %81 = vector.load %arg4[%c0_25, %c0_26] : memref<64x64xbf16, #tpu.memory_space<vmem>>, vector<64x64xbf16>
    %cst_27 = arith.constant dense<0.000000e+00> : vector<2x64xf32>
    %82 = tpu.matmul %80, %81, %cst_27 {dimension_numbers = #tpu.dot_dimension_numbers<[1], [0], [0], [1], [0, 0, 1, 1], [], []>} : vector<2x64xbf16>, vector<64x64xbf16>, vector<2x64xf32> -> vector<2x64xf32>
    %c0_28 = arith.constant 0 : index
    %c0_29 = arith.constant 0 : index
    %83 = vector.load %arg5[%c0_28, %c0_29] : memref<1x64xf32, #tpu.memory_space<vmem>>, vector<1x64xf32>
    %84 = vector.broadcast %83 : vector<1x64xf32> to vector<2x64xf32>
    %85 = arith.addf %82, %84 : vector<2x64xf32>
    %86 = arith.extf %0 : vector<2x64xbf16> to vector<2x64xf32>
    %87 = arith.addf %85, %86 : vector<2x64xf32>
    %cst_30 = arith.constant dense<0.000000e+00> : vector<2xf32>
    %88 = vector.multi_reduction <add>, %87, %cst_30 [1] : vector<2x64xf32> to vector<2xf32>
    %89 = vector.shape_cast %88 : vector<2xf32> to vector<2x1xf32>
    %cst_31 = arith.constant 6.400000e+01 : f32
    %90 = vector.broadcast %cst_31 : f32 to vector<2x1xf32>
    %91 = arith.divf %89, %90 : vector<2x1xf32>
    %92 = vector.broadcast %91 : vector<2x1xf32> to vector<2x64xf32>
    %93 = arith.subf %87, %92 : vector<2x64xf32>
    %94 = arith.mulf %93, %93 : vector<2x64xf32>
    %cst_32 = arith.constant dense<0.000000e+00> : vector<2xf32>
    %95 = vector.multi_reduction <add>, %94, %cst_32 [1] : vector<2x64xf32> to vector<2xf32>
    %96 = vector.shape_cast %95 : vector<2xf32> to vector<2x1xf32>
    %cst_33 = arith.constant 6.400000e+01 : f32
    %97 = vector.broadcast %cst_33 : f32 to vector<2x1xf32>
    %98 = arith.divf %96, %97 : vector<2x1xf32>
    %99 = vector.broadcast %91 : vector<2x1xf32> to vector<2x64xf32>
    %100 = arith.subf %87, %99 : vector<2x64xf32>
    %cst_34 = arith.constant 9.99999974E-6 : f32
    %101 = vector.broadcast %cst_34 : f32 to vector<2x1xf32>
    %102 = arith.addf %98, %101 : vector<2x1xf32>
    %103 = math.rsqrt %102 : vector<2x1xf32>
    %104 = vector.broadcast %103 : vector<2x1xf32> to vector<2x64xf32>
    %105 = arith.mulf %100, %104 : vector<2x64xf32>
    %c0_35 = arith.constant 0 : index
    %c0_36 = arith.constant 0 : index
    %106 = vector.load %arg6[%c0_35, %c0_36] : memref<1x64xf32, #tpu.memory_space<vmem>>, vector<1x64xf32>
    %107 = vector.broadcast %106 : vector<1x64xf32> to vector<2x64xf32>
    %108 = arith.mulf %105, %107 : vector<2x64xf32>
    %c0_37 = arith.constant 0 : index
    %c0_38 = arith.constant 0 : index
    %109 = vector.load %arg7[%c0_37, %c0_38] : memref<1x64xf32, #tpu.memory_space<vmem>>, vector<1x64xf32>
    %110 = vector.broadcast %109 : vector<1x64xf32> to vector<2x64xf32>
    %111 = arith.addf %108, %110 : vector<2x64xf32>
    %112 = arith.truncf %111 : vector<2x64xf32> to vector<2x64xbf16>
    %c0_39 = arith.constant 0 : index
    %c0_40 = arith.constant 0 : index
    %113 = vector.load %arg8[%c0_39, %c0_40] : memref<2x64xbf16, #tpu.memory_space<vmem>>, vector<2x64xbf16>
    tpu.vector_store %arg8[%c0_39, %c0_40], %112 {strides = array<i32>} : memref<2x64xbf16, #tpu.memory_space<vmem>>, vector<2x64xbf16>,
    return
  }
  func.func @transform_0(%arg0: i32) -> (i32, i32) {
    %c0_i32 = arith.constant 0 : i32
    %c0_i32_0 = arith.constant 0 : i32
    %c0_i32_1 = arith.constant 0 : i32
    return %c0_i32, %c0_i32_0 : i32, i32
  }
  func.func @transform_1(%arg0: i32) -> (i32, i32) {
    %c0_i32 = arith.constant 0 : i32
    %c0_i32_0 = arith.constant 0 : i32
    %c0_i32_1 = arith.constant 0 : i32
    return %c0_i32, %c0_i32_0 : i32, i32
  }
  func.func @transform_2(%arg0: i32) -> (i32, i32) {
    %c0_i32 = arith.constant 0 : i32
    %c0_i32_0 = arith.constant 0 : i32
    %c0_i32_1 = arith.constant 0 : i32
    return %c0_i32, %c0_i32_0 : i32, i32
  }
  func.func @transform_3(%arg0: i32) -> (i32, i32) {
    %c0_i32 = arith.constant 0 : i32
    %c0_i32_0 = arith.constant 0 : i32
    %c0_i32_1 = arith.constant 0 : i32
    return %c0_i32, %c0_i32_0 : i32, i32
  }
  func.func @transform_4(%arg0: i32) -> (i32, i32) {
    %c0_i32 = arith.constant 0 : i32
    %c0_i32_0 = arith.constant 0 : i32
    %c0_i32_1 = arith.constant 0 : i32
    return %c0_i32, %c0_i32_0 : i32, i32
  }
  func.func @transform_5(%arg0: i32) -> (i32, i32) {
    %c0_i32 = arith.constant 0 : i32
    %c0_i32_0 = arith.constant 0 : i32
    %c0_i32_1 = arith.constant 0 : i32
    return %c0_i32, %c0_i32_0 : i32, i32
  }
  func.func @transform_6(%arg0: i32) -> (i32, i32) {
    %c0_i32 = arith.constant 0 : i32
    %c0_i32_0 = arith.constant 0 : i32
    %c0_i32_1 = arith.constant 0 : i32
    return %c0_i32, %c0_i32_0 : i32, i32
  }
  func.func @transform_7(%arg0: i32) -> (i32, i32) {
    %c0_i32 = arith.constant 0 : i32
    %c0_i32_0 = arith.constant 0 : i32
    %c0_i32_1 = arith.constant 0 : i32
    return %c0_i32, %c0_i32_0 : i32, i32
  }
}

module attributes {stable_mosaic.version = 11 : i64} {
  func.func @_ffn_block_kernel(%arg0: i32, %arg1: memref<2x64xbf16, #tpu.memory_space<vmem>>, %arg2: memref<64x256xbf16, #tpu.memory_space<vmem>>, %arg3: memref<1x256xf32, #tpu.memory_space<vmem>>, %arg4: memref<256x64xbf16, #tpu.memory_space<vmem>>, %arg5: memref<1x64xf32, #tpu.memory_space<vmem>>, %arg6: memref<1x64xf32, #tpu.memory_space<vmem>>, %arg7: memref<1x64xf32, #tpu.memory_space<vmem>>, %arg8: memref<2x64xbf16, #tpu.memory_space<vmem>>) attributes {dimension_semantics = [#tpu.dimension_semantics<parallel>], iteration_bounds = array<i64: 1>, scalar_prefetch = 0 : i64, scratch_operands = 0 : i64, tpu.core_type = #tpu.core_type<tc>, window_params = [{transform_indices = @transform_0, window_bounds = array<i64: 2, 64>}, {pipeline_mode = #tpu.pipeline_mode<synchronous>, transform_indices = @transform_1, window_bounds = array<i64: 64, 256>}, {pipeline_mode = #tpu.pipeline_mode<synchronous>, transform_indices = @transform_2, window_bounds = array<i64: 1, 256>}, {pipeline_mode = #tpu.pipeline_mode<synchronous>, transform_indices = @transform_3, window_bounds = array<i64: 256, 64>}, {pipeline_mode = #tpu.pipeline_mode<synchronous>, transform_indices = @transform_4, window_bounds = array<i64: 1, 64>}, {pipeline_mode = #tpu.pipeline_mode<synchronous>, transform_indices = @transform_5, window_bounds = array<i64: 1, 64>}, {pipeline_mode = #tpu.pipeline_mode<synchronous>, transform_indices = @transform_6, window_bounds = array<i64: 1, 64>}, {transform_indices = @transform_7, window_bounds = array<i64: 2, 64>}]} {
    %c0 = arith.constant 0 : index
    %c0_0 = arith.constant 0 : index
    %0 = vector.load %arg1[%c0, %c0_0] : memref<2x64xbf16, #tpu.memory_space<vmem>>, vector<2x64xbf16>
    %c0_1 = arith.constant 0 : index
    %c0_2 = arith.constant 0 : index
    %1 = vector.load %arg2[%c0_1, %c0_2] : memref<64x256xbf16, #tpu.memory_space<vmem>>, vector<64x256xbf16>
    %cst = arith.constant dense<0.000000e+00> : vector<2x256xf32>
    %2 = tpu.matmul %0, %1, %cst {dimension_numbers = #tpu.dot_dimension_numbers<[1], [0], [0], [1], [0, 0, 1, 1], [], []>} : vector<2x64xbf16>, vector<64x256xbf16>, vector<2x256xf32> -> vector<2x256xf32>
    %c0_3 = arith.constant 0 : index
    %c0_4 = arith.constant 0 : index
    %3 = vector.load %arg3[%c0_3, %c0_4] : memref<1x256xf32, #tpu.memory_space<vmem>>, vector<1x256xf32>
    %4 = vector.broadcast %3 : vector<1x256xf32> to vector<2x256xf32>
    %5 = arith.addf %2, %4 : vector<2x256xf32>
    %cst_5 = arith.constant 0.000000e+00 : f32
    %6 = vector.broadcast %cst_5 : f32 to vector<2x256xf32>
    %7 = arith.maximumf %5, %6 : vector<2x256xf32>
    %8 = arith.truncf %7 : vector<2x256xf32> to vector<2x256xbf16>
    %c0_6 = arith.constant 0 : index
    %c0_7 = arith.constant 0 : index
    %9 = vector.load %arg4[%c0_6, %c0_7] : memref<256x64xbf16, #tpu.memory_space<vmem>>, vector<256x64xbf16>
    %cst_8 = arith.constant dense<0.000000e+00> : vector<2x64xf32>
    %10 = tpu.matmul %8, %9, %cst_8 {dimension_numbers = #tpu.dot_dimension_numbers<[1], [0], [0], [1], [0, 0, 1, 1], [], []>} : vector<2x256xbf16>, vector<256x64xbf16>, vector<2x64xf32> -> vector<2x64xf32>
    %c0_9 = arith.constant 0 : index
    %c0_10 = arith.constant 0 : index
    %11 = vector.load %arg5[%c0_9, %c0_10] : memref<1x64xf32, #tpu.memory_space<vmem>>, vector<1x64xf32>
    %12 = vector.broadcast %11 : vector<1x64xf32> to vector<2x64xf32>
    %13 = arith.addf %10, %12 : vector<2x64xf32>
    %14 = arith.extf %0 : vector<2x64xbf16> to vector<2x64xf32>
    %15 = arith.addf %13, %14 : vector<2x64xf32>
    %cst_11 = arith.constant dense<0.000000e+00> : vector<2xf32>
    %16 = vector.multi_reduction <add>, %15, %cst_11 [1] : vector<2x64xf32> to vector<2xf32>
    %17 = vector.shape_cast %16 : vector<2xf32> to vector<2x1xf32>
    %cst_12 = arith.constant 6.400000e+01 : f32
    %18 = vector.broadcast %cst_12 : f32 to vector<2x1xf32>
    %19 = arith.divf %17, %18 : vector<2x1xf32>
    %20 = vector.broadcast %19 : vector<2x1xf32> to vector<2x64xf32>
    %21 = arith.subf %15, %20 : vector<2x64xf32>
    %22 = arith.mulf %21, %21 : vector<2x64xf32>
    %cst_13 = arith.constant dense<0.000000e+00> : vector<2xf32>
    %23 = vector.multi_reduction <add>, %22, %cst_13 [1] : vector<2x64xf32> to vector<2xf32>
    %24 = vector.shape_cast %23 : vector<2xf32> to vector<2x1xf32>
    %cst_14 = arith.constant 6.400000e+01 : f32
    %25 = vector.broadcast %cst_14 : f32 to vector<2x1xf32>
    %26 = arith.divf %24, %25 : vector<2x1xf32>
    %27 = vector.broadcast %19 : vector<2x1xf32> to vector<2x64xf32>
    %28 = arith.subf %15, %27 : vector<2x64xf32>
    %cst_15 = arith.constant 9.99999974E-6 : f32
    %29 = vector.broadcast %cst_15 : f32 to vector<2x1xf32>
    %30 = arith.addf %26, %29 : vector<2x1xf32>
    %31 = math.rsqrt %30 : vector<2x1xf32>
    %32 = vector.broadcast %31 : vector<2x1xf32> to vector<2x64xf32>
    %33 = arith.mulf %28, %32 : vector<2x64xf32>
    %c0_16 = arith.constant 0 : index
    %c0_17 = arith.constant 0 : index
    %34 = vector.load %arg6[%c0_16, %c0_17] : memref<1x64xf32, #tpu.memory_space<vmem>>, vector<1x64xf32>
    %35 = vector.broadcast %34 : vector<1x64xf32> to vector<2x64xf32>
    %36 = arith.mulf %33, %35 : vector<2x64xf32>
    %c0_18 = arith.constant 0 : index
    %c0_19 = arith.constant 0 : index
    %37 = vector.load %arg7[%c0_18, %c0_19] : memref<1x64xf32, #tpu.memory_space<vmem>>, vector<1x64xf32>
    %38 = vector.broadcast %37 : vector<1x64xf32> to vector<2x64xf32>
    %39 = arith.addf %36, %38 : vector<2x64xf32>
    %40 = arith.truncf %39 : vector<2x64xf32> to vector<2x64xbf16>
    %c0_20 = arith.constant 0 : index
    %c0_21 = arith.constant 0 : index
    %41 = vector.load %arg8[%c0_20, %c0_21] : memref<2x64xbf16, #tpu.memory_space<vmem>>, vector<2x64xbf16>
    tpu.vector_store %arg8[%c0_20, %c0_21], %40 {strides = array<i32>} : memref<2x64xbf16, #tpu.memory_space<vmem>>, vector<2x64xbf16>,
    return
  }
  func.func @transform_0(%arg0: i32) -> (i32, i32) {
    %c0_i32 = arith.constant 0 : i32
    %c0_i32_0 = arith.constant 0 : i32
    return %arg0, %c0_i32 : i32, i32
  }
  func.func @transform_1(%arg0: i32) -> (i32, i32) {
    %c0_i32 = arith.constant 0 : i32
    %c0_i32_0 = arith.constant 0 : i32
    %c0_i32_1 = arith.constant 0 : i32
    return %c0_i32, %c0_i32_0 : i32, i32
  }
  func.func @transform_2(%arg0: i32) -> (i32, i32) {
    %c0_i32 = arith.constant 0 : i32
    %c0_i32_0 = arith.constant 0 : i32
    %c0_i32_1 = arith.constant 0 : i32
    return %c0_i32, %c0_i32_0 : i32, i32
  }
  func.func @transform_3(%arg0: i32) -> (i32, i32) {
    %c0_i32 = arith.constant 0 : i32
    %c0_i32_0 = arith.constant 0 : i32
    %c0_i32_1 = arith.constant 0 : i32
    return %c0_i32, %c0_i32_0 : i32, i32
  }
  func.func @transform_4(%arg0: i32) -> (i32, i32) {
    %c0_i32 = arith.constant 0 : i32
    %c0_i32_0 = arith.constant 0 : i32
    %c0_i32_1 = arith.constant 0 : i32
    return %c0_i32, %c0_i32_0 : i32, i32
  }
  func.func @transform_5(%arg0: i32) -> (i32, i32) {
    %c0_i32 = arith.constant 0 : i32
    %c0_i32_0 = arith.constant 0 : i32
    %c0_i32_1 = arith.constant 0 : i32
    return %c0_i32, %c0_i32_0 : i32, i32
  }
  func.func @transform_6(%arg0: i32) -> (i32, i32) {
    %c0_i32 = arith.constant 0 : i32
    %c0_i32_0 = arith.constant 0 : i32
    %c0_i32_1 = arith.constant 0 : i32
    return %c0_i32, %c0_i32_0 : i32, i32
  }
  func.func @transform_7(%arg0: i32) -> (i32, i32) {
    %c0_i32 = arith.constant 0 : i32
    %c0_i32_0 = arith.constant 0 : i32
    return %arg0, %c0_i32 : i32, i32
  }
}

module attributes {stable_mosaic.version = 11 : i64} {
  func.func @_mm_kernel(%arg0: i32, %arg1: memref<2x64xbf16, #tpu.memory_space<vmem>>, %arg2: memref<64x2xbf16, #tpu.memory_space<vmem>>, %arg3: memref<1x2xf32, #tpu.memory_space<vmem>>, %arg4: memref<2x2xf32, #tpu.memory_space<vmem>>) attributes {dimension_semantics = [#tpu.dimension_semantics<parallel>], iteration_bounds = array<i64: 1>, scalar_prefetch = 0 : i64, scratch_operands = 0 : i64, tpu.core_type = #tpu.core_type<tc>, window_params = [{transform_indices = @transform_0, window_bounds = array<i64: 2, 64>}, {pipeline_mode = #tpu.pipeline_mode<synchronous>, transform_indices = @transform_1, window_bounds = array<i64: 64, 2>}, {pipeline_mode = #tpu.pipeline_mode<synchronous>, transform_indices = @transform_2, window_bounds = array<i64: 1, 2>}, {transform_indices = @transform_3, window_bounds = array<i64: 2, 2>}]} {
    %c0 = arith.constant 0 : index
    %c0_0 = arith.constant 0 : index
    %0 = vector.load %arg1[%c0, %c0_0] : memref<2x64xbf16, #tpu.memory_space<vmem>>, vector<2x64xbf16>
    %c0_1 = arith.constant 0 : index
    %c0_2 = arith.constant 0 : index
    %1 = vector.load %arg2[%c0_1, %c0_2] : memref<64x2xbf16, #tpu.memory_space<vmem>>, vector<64x2xbf16>
    %cst = arith.constant dense<0.000000e+00> : vector<2x2xf32>
    %2 = tpu.matmul %0, %1, %cst {dimension_numbers = #tpu.dot_dimension_numbers<[1], [0], [0], [1], [0, 0, 1, 1], [], []>} : vector<2x64xbf16>, vector<64x2xbf16>, vector<2x2xf32> -> vector<2x2xf32>
    %c0_3 = arith.constant 0 : index
    %c0_4 = arith.constant 0 : index
    %3 = vector.load %arg3[%c0_3, %c0_4] : memref<1x2xf32, #tpu.memory_space<vmem>>, vector<1x2xf32>
    %4 = vector.broadcast %3 : vector<1x2xf32> to vector<2x2xf32>
    %5 = arith.addf %2, %4 : vector<2x2xf32>
    %cst_5 = arith.constant 0.000000e+00 : f32
    %6 = vector.broadcast %cst_5 : f32 to vector<2x2xf32>
    %7 = arith.subf %6, %5 : vector<2x2xf32>
    %8 = math.exp %7 : vector<2x2xf32>
    %cst_6 = arith.constant 1.000000e+00 : f32
    %9 = vector.broadcast %cst_6 : f32 to vector<2x2xf32>
    %10 = arith.addf %9, %8 : vector<2x2xf32>
    %11 = tpu.reciprocal %10 {approx = true} : vector<2x2xf32> -> vector<2x2xf32>
    %cst_7 = arith.constant 0.000000e+00 : f32
    %cst_8 = arith.constant 1.000000e+00 : f32
    %12 = vector.broadcast %cst_7 : f32 to vector<2x2xf32>
    %13 = arith.maximumf %12, %11 : vector<2x2xf32>
    %14 = vector.broadcast %cst_8 : f32 to vector<2x2xf32>
    %15 = arith.minimumf %14, %13 : vector<2x2xf32>
    %c0_9 = arith.constant 0 : index
    %c0_10 = arith.constant 0 : index
    %16 = vector.load %arg4[%c0_9, %c0_10] : memref<2x2xf32, #tpu.memory_space<vmem>>, vector<2x2xf32>
    tpu.vector_store %arg4[%c0_9, %c0_10], %15 {strides = array<i32>} : memref<2x2xf32, #tpu.memory_space<vmem>>, vector<2x2xf32>,
    return
  }
  func.func @transform_0(%arg0: i32) -> (i32, i32) {
    %c0_i32 = arith.constant 0 : i32
    %c0_i32_0 = arith.constant 0 : i32
    return %arg0, %c0_i32 : i32, i32
  }
  func.func @transform_1(%arg0: i32) -> (i32, i32) {
    %c0_i32 = arith.constant 0 : i32
    %c0_i32_0 = arith.constant 0 : i32
    %c0_i32_1 = arith.constant 0 : i32
    return %c0_i32, %c0_i32_0 : i32, i32
  }
  func.func @transform_2(%arg0: i32) -> (i32, i32) {
    %c0_i32 = arith.constant 0 : i32
    %c0_i32_0 = arith.constant 0 : i32
    %c0_i32_1 = arith.constant 0 : i32
    return %c0_i32, %c0_i32_0 : i32, i32
  }
  func.func @transform_3(%arg0: i32) -> (i32, i32) {
    %c0_i32 = arith.constant 0 : i32
    %c0_i32_0 = arith.constant 0 : i32
    return %arg0, %c0_i32 : i32, i32
  }
}

</mosaic_0001>

<bundles_post_ra>
// kernel: _lambda_.10
= control target key start
LH: loop header
LB: loop body
LE: loop exit
PB: predicated region body
PF: predicated region fallthrough
CT: control target
= control target key end

     0   :  { %vm343_vm0 = vcmask 1043456   ;;  %vm344_vm1 = vcmask 1044480   ;;  %vm246_vm2 = vcmask 72704   ;;  %v1109_v1 = vmov 65535   ;;  %s1485_s1 = inlined_call_operand.vmem [shape: bf16[9,4], index: 1, kind: input, shape index: {}]   ;;  %s1486_s0 = inlined_call_operand.vmem [shape: bf16[4,128,9], index: 0, kind: input, shape index: {}]   ;;  %s1487_s2 = inlined_call_operand.vmem [shape: f32[1,4], index: 2, kind: input, shape index: {}]   ;;  %s1488_s3 = inlined_call_operand.vmem [shape: bf16[128,4], index: 3, kind: output, shape index: {}]  }
   0x1   :  { %v1076_v0 = vld [vmem:[%s1485_s1] sm:$0x1f]   ;;  %v345_v2 = vsel %vm343_vm0, 4294967295, %v1109_v1  ;;  %v1078_v7 = vld [vmem:[%s1486_s0 + $0x8] sm:$0xff]   ;;  %v1081_v9 = vld [vmem:[%s1486_s0 + $0x10] sm:$0xff]   ;;  %vm639_vm3 = vcmask 31744  }
   0x2   :  { %v1077_v3 = vld [vmem:[%s1486_s0] sm:$0xff]   ;;  %v346_v4 = vsel %vm344_vm1, %v345_v2, 0  ;;  %v1080_v8 = vld [vmem:[%s1486_s0 + $0x88] sm:$0xff]   ;;  %v1083_v10 = vld [vmem:[%s1486_s0 + $0x90] sm:$0xff]   ;;  %vm855_vm4 = vcmask 27648  }
   0x3   :  { %v348_v5 = vand.u32 %v1076_v0, %v346_v4  ;;  %1009 = vmatprep.mubr.msk.bf16.mxu0 %vm246_vm2, %v1077_v3  ;;  %v1079_v6 = vld [vmem:[%s1486_s0 + $0x80] sm:$0xff]   ;;  %v1082_v11 = vld [vmem:[%s1486_s0 + $0x18] sm:$0xff]   ;;  %v1086_v15 = vld [vmem:[%s1486_s0 + $0x28] sm:$0xff]  }
   0x4   :  { %1041 = vmatprep.mubr.msk.bf16.mxu1 %vm246_vm2, %v1079_v6  ;;  %v1084_v12 = vld [vmem:[%s1486_s0 + $0x98] sm:$0xff]   ;;  %v1085_v13 = vld [vmem:[%s1486_s0 + $0x20] sm:$0xff]   ;;  %v1088_v16 = vld [vmem:[%s1486_s0 + $0xa8] sm:$0xff]  }
   0x5   :  { %1007 = vmatprep.subr.bf16.mxu0 %v348_v5  ;;  %1073 = vmatprep.subr.bf16.mxu1 %v348_v5  ;;  %v1087_v14 = vld [vmem:[%s1486_s0 + $0xa0] sm:$0xff]   ;;  %v1089_v17 = vld [vmem:[%s1486_s0 + $0x30] sm:$0xff]   ;;  %v1090_v19 = vld [vmem:[%s1486_s0 + $0x38] sm:$0xff]  }
   0x6   :  { %1008 = vmatpush3.bf16.msra.mxu0 %v348_v5  ;;  %1074 = vmatpush3.bf16.msra.mxu1 %v348_v5  ;;  %v1091_v18 = vld [vmem:[%s1486_s0 + $0xb0] sm:$0xff]   ;;  %v1092_v20 = vld [vmem:[%s1486_s0 + $0xb8] sm:$0xff]   ;;  %v1093_v21 = vld [vmem:[%s1486_s0 + $0x40] sm:$0xff]  }
   0x7   :  { %v1095_v22 = vld [vmem:[%s1486_s0 + $0xc0] sm:$0xff]   ;;  %v1094_v23 = vld [vmem:[%s1486_s0 + $0x48] sm:$0xff]   ;;  %v1097_v25 = vld [vmem:[%s1486_s0 + $0x50] sm:$0xff]  }
   0x8   :  { %v1096_v24 = vld [vmem:[%s1486_s0 + $0xc8] sm:$0xff]   ;;  %v1099_v26 = vld [vmem:[%s1486_s0 + $0xd0] sm:$0xff]   ;;  %v1098_v27 = vld [vmem:[%s1486_s0 + $0x58] sm:$0xff]  }
   0x9   :  { %1010 = vmatmul.mubr.msk.bf16.vlgmr.msra.gmra.mrb[0].mxu0 %vm246_vm2, %v1078_v7  ;;  %1042 = vmatmul.mubr.msk.bf16.vlgmr.msra.gmra.mrb[0].mxu1 %vm246_vm2, %v1080_v8  ;;  %v1100_v28 = vld [vmem:[%s1486_s0 + $0xd8] sm:$0xff]   ;;  %v1101_v29 = vld [vmem:[%s1486_s0 + $0x60] sm:$0xff]   ;;  %v1102_v31 = vld [vmem:[%s1486_s0 + $0x68] sm:$0xff]  }
   0xa   :  { %1013 = vmatprep.mubr.msk.bf16.mxu0 %vm246_vm2, %v1081_v9  ;;  %1045 = vmatprep.mubr.msk.bf16.mxu1 %vm246_vm2, %v1083_v10  ;;  %v1103_v30 = vld [vmem:[%s1486_s0 + $0xe0] sm:$0xff]   ;;  %v1104_v32 = vld [vmem:[%s1486_s0 + $0xe8] sm:$0xff]   ;;  %v1105_v33 = vld [vmem:[%s1486_s0 + $0x70] sm:$0xff]  }
   0xb   :  { %v1107_v34 = vld [vmem:[%s1486_s0 + $0xf0] sm:$0xff]   ;;  %v1106_v35 = vld [vmem:[%s1486_s0 + $0x78] sm:$0xff]  }
   0xc   :  { %v1108_v36 = vld [vmem:[%s1486_s0 + $0xf8] sm:$0xff]  }
  0x11   :  { %1014 = vmatmul.mubr.msk.bf16.gmra.mrb[4].mxu0 %vm246_vm2, %v1082_v11  ;;  %1046 = vmatmul.mubr.msk.bf16.gmra.mrb[4].mxu1 %vm246_vm2, %v1084_v12 }
  0x12   :  { %1017 = vmatprep.mubr.msk.bf16.mxu0 %vm246_vm2, %v1085_v13  ;;  %1049 = vmatprep.mubr.msk.bf16.mxu1 %vm246_vm2, %v1087_v14 }
  0x19   :  { %1018 = vmatmul.mubr.msk.bf16.gmra.mrb[8].mxu0 %vm246_vm2, %v1086_v15  ;;  %1050 = vmatmul.mubr.msk.bf16.gmra.mrb[8].mxu1 %vm246_vm2, %v1088_v16 }
  0x1a   :  { %1021 = vmatprep.mubr.msk.bf16.mxu0 %vm246_vm2, %v1089_v17  ;;  %1053 = vmatprep.mubr.msk.bf16.mxu1 %vm246_vm2, %v1091_v18 }
  0x21   :  { %1022 = vmatmul.mubr.msk.bf16.gmra.mrb[12].mxu0 %vm246_vm2, %v1090_v19  ;;  %1054 = vmatmul.mubr.msk.bf16.gmra.mrb[12].mxu1 %vm246_vm2, %v1092_v20 }
  0x22   :  { %1025 = vmatprep.mubr.msk.bf16.mxu0 %vm246_vm2, %v1093_v21  ;;  %1057 = vmatprep.mubr.msk.bf16.mxu1 %vm246_vm2, %v1095_v22 }
  0x29   :  { %1026 = vmatmul.mubr.msk.bf16.gmra.mrb[16].mxu0 %vm246_vm2, %v1094_v23  ;;  %1058 = vmatmul.mubr.msk.bf16.gmra.mrb[16].mxu1 %vm246_vm2, %v1096_v24 }
  0x2a   :  { %1029 = vmatprep.mubr.msk.bf16.mxu0 %vm246_vm2, %v1097_v25  ;;  %1061 = vmatprep.mubr.msk.bf16.mxu1 %vm246_vm2, %v1099_v26 }
  0x31   :  { %1030 = vmatmul.mubr.msk.bf16.gmra.mrb[20].mxu0 %vm246_vm2, %v1098_v27  ;;  %1062 = vmatmul.mubr.msk.bf16.gmra.mrb[20].mxu1 %vm246_vm2, %v1100_v28 }
  0x32   :  { %1033 = vmatprep.mubr.msk.bf16.mxu0 %vm246_vm2, %v1101_v29  ;;  %1065 = vmatprep.mubr.msk.bf16.mxu1 %vm246_vm2, %v1103_v30 }
  0x39   :  { %1034 = vmatmul.mubr.msk.bf16.gmra.mrb[24].mxu0 %vm246_vm2, %v1102_v31  ;;  %1066 = vmatmul.mubr.msk.bf16.gmra.mrb[24].mxu1 %vm246_vm2, %v1104_v32 }
  0x3a   :  { %1037 = vmatprep.mubr.msk.bf16.mxu0 %vm246_vm2, %v1105_v33  ;;  %1069 = vmatprep.mubr.msk.bf16.mxu1 %vm246_vm2, %v1107_v34 }
  0x41   :  { %1038 = vmatmul.mubr.msk.bf16.gmra.mrb[28].mxu0 %vm246_vm2, %v1106_v35  ;;  %1070 = vmatmul.mubr.msk.bf16.gmra.mrb[28].mxu1 %vm246_vm2, %v1108_v36 }
  0xdc   :  { %v1011_v37 = vpop.f32.mrb[0].mxu0  ;;  %v1043_v38 = vpop.f32.mrb[0].mxu1 }
  0xdd   :  { %v384_v39 = vpop.f32.mrb[1].mxu0  ;;  %v512_v40 = vpop.f32.mrb[1].mxu1  ;;  %v654_v5 = vsel %vm639_vm3, %v1011_v37, -inf  ;;  %v657_v7 = vsel %vm639_vm3, %v1043_v38, -inf }
  0xde   :  { %v1012_v41 = vpop.f32.mrb[2].mxu0  ;;  %v1044_v42 = vpop.f32.mrb[2].mxu1  ;;  %v640_v6 = vsel %vm639_vm3, %v384_v39, -inf  ;;  %v643_v9 = vsel %vm639_vm3, %v512_v40, -inf }
  0xdf   :  { %v387_v43 = vpop.f32.mrb[3].mxu0  ;;  %v515_v44 = vpop.f32.mrb[3].mxu1  ;;  %v661_v8 = vsel %vm639_vm3, %v1012_v41, -inf  ;;  %v664_v11 = vsel %vm639_vm3, %v1044_v42, -inf }
  0xe0   :  { %v647_v10 = vsel %vm639_vm3, %v387_v43, -inf  ;;  %v650_v12 = vsel %vm639_vm3, %v515_v44, -inf }
  0xe4   :  { %v1015_v45 = vpop.f32.mrb[4].mxu0  ;;  %v1047_v46 = vpop.f32.mrb[4].mxu1 }
  0xe5   :  { %v400_v47 = vpop.f32.mrb[5].mxu0  ;;  %v528_v48 = vpop.f32.mrb[5].mxu1  ;;  %v1276_v13 = vsel %vm639_vm3, %v1015_v45, -inf  ;;  %v1282_v15 = vsel %vm639_vm3, %v1047_v46, -inf }
  0xe6   :  { %v1016_v49 = vpop.f32.mrb[6].mxu0  ;;  %v1048_v50 = vpop.f32.mrb[6].mxu1  ;;  %v1279_v14 = vsel %vm639_vm3, %v400_v47, -inf  ;;  %v1288_v17 = vsel %vm639_vm3, %v528_v48, -inf  ;;  %v1335_v48 = vld [vmem:[%s1487_s2] ss:$0 sm:$0xff] }
  0xe7   :  { %v403_v51 = vpop.f32.mrb[7].mxu0  ;;  %v531_v52 = vpop.f32.mrb[7].mxu1  ;;  %v1285_v16 = vsel %vm639_vm3, %v1016_v49, -inf  ;;  %v1294_v19 = vsel %vm639_vm3, %v1048_v50, -inf }
  0xe8   :  { %v1291_v18 = vsel %vm639_vm3, %v403_v51, -inf  ;;  %v1297_v20 = vsel %vm639_vm3, %v531_v52, -inf }
  0xec   :  { %v1019_v53 = vpop.f32.mrb[8].mxu0  ;;  %v1051_v54 = vpop.f32.mrb[8].mxu1 }
  0xed   :  { %v416_v55 = vpop.f32.mrb[9].mxu0  ;;  %v544_v56 = vpop.f32.mrb[9].mxu1  ;;  %v1300_v21 = vsel %vm639_vm3, %v1019_v53, -inf  ;;  %v1306_v25 = vsel %vm639_vm3, %v1051_v54, -inf }
  0xee   :  { %v1020_v57 = vpop.f32.mrb[10].mxu0  ;;  %v1052_v58 = vpop.f32.mrb[10].mxu1  ;;  %v1303_v24 = vsel %vm639_vm3, %v416_v55, -inf  ;;  %v1309_v26 = vsel %vm639_vm3, %v544_v56, -inf }
  0xef   :  { %v419_v59 = vpop.f32.mrb[11].mxu0  ;;  %v547_v60 = vpop.f32.mrb[11].mxu1  ;;  %v1313_v30 = vsel %vm639_vm3, %v1020_v57, -inf  ;;  %v1316_v31 = vsel %vm639_vm3, %v1052_v58, -inf }
  0xf0   :  { %v1320_v36 = vsel %vm639_vm3, %v419_v59, -inf  ;;  %v1327_v46 = vsel %vm639_vm3, %v547_v60, -inf }
  0xf4   :  { %v1023_v61 = vpop.f32.mrb[12].mxu0  ;;  %v1055_v62 = vpop.f32.mrb[12].mxu1 }
  0xf5   :  { %v432_v63 = vpop.f32.mrb[13].mxu0  ;;  %v560_v0 = vpop.f32.mrb[13].mxu1  ;;  %v1330_v47 = vsel %vm639_vm3, %v1023_v61, -inf  ;;  %v1341_v52 = vsel %vm639_vm3, %v1055_v62, -inf }
  0xf6   :  { %v1024_v1 = vpop.f32.mrb[14].mxu0  ;;  %v1261_v2 = vpop.f32.mrb[14].mxu1  ;;  %v1338_v51 = vsel %vm639_vm3, %v432_v63, -inf  ;;  %v1344_v55 = vsel %vm639_vm3, %v560_v0, -inf }
  0xf7   :  { %v1263_v3 = vpop.f32.mrb[15].mxu0  ;;  %v1265_v4 = vpop.f32.mrb[15].mxu1  ;;  %v1348_v59 = vsel %vm639_vm3, %v1024_v1, -inf }
  0xfc   :  { %v1027_v22 = vpop.f32.mrb[16].mxu0  ;;  %v1059_v23 = vpop.f32.mrb[16].mxu1 }
  0xfd   :  { %v655_v27 = vsel %vm639_vm3, %v1027_v22, -inf  ;;  %v448_v28 = vpop.f32.mrb[17].mxu0  ;;  %v576_v29 = vpop.f32.mrb[17].mxu1  ;;  %v659_v38 = vsel %vm639_vm3, %v1059_v23, -inf }
  0xfe   :  { %v656_v32 = vmax.f32 %v654_v5, %v655_v27  ;;  %v641_v33 = vsel %vm639_vm3, %v448_v28, -inf  ;;  %v1028_v34 = vpop.f32.mrb[18].mxu0  ;;  %v1060_v35 = vpop.f32.mrb[18].mxu1  ;;  %v645_v44 = vsel %vm639_vm3, %v576_v29, -inf }
  0xff   :  { %v642_v37 = vmax.f32 %v640_v6, %v641_v33  ;;  %v662_v39 = vsel %vm639_vm3, %v1028_v34, -inf  ;;  %v451_v40 = vpop.f32.mrb[19].mxu0  ;;  %v579_v41 = vpop.f32.mrb[19].mxu1  ;;  %v666_v57 = vsel %vm639_vm3, %v1060_v35, -inf }
 0x100   :  { %v658_v42 = vmax.f32 %v656_v32, %v657_v7  ;;  %v663_v43 = vmax.f32 %v661_v8, %v662_v39  ;;  %v648_v45 = vsel %vm639_vm3, %v451_v40, -inf  ;;  %v652_v63 = vsel %vm639_vm3, %v579_v41, -inf }
 0x101   :  { %v644_v49 = vmax.f32 %v642_v37, %v643_v9  ;;  %v649_v50 = vmax.f32 %v647_v10, %v648_v45 }
 0x102   :  { %v660_v53 = vmax.f32 %v658_v42, %v659_v38  ;;  %v665_v54 = vmax.f32 %v663_v43, %v664_v11 }
 0x103   :  { %v646_v56 = vmax.f32 %v644_v49, %v645_v44  ;;  %v651_v58 = vmax.f32 %v649_v50, %v650_v12 }
 0x104   :  { %v761_v60 = vadd.f32 %v1335_v48, %v660_v53  ;;  %v667_v61 = vmax.f32 %v665_v54, %v666_v57  ;;  %v1031_v5 = vpop.f32.mrb[20].mxu0  ;;  %v1063_v62 = vpop.f32.mrb[20].mxu1  ;;  %v1379_v53 = vsel %vm639_vm3, %v1261_v2, -inf }
 0x105   :  { %v759_v6 = vadd.f32 %v1335_v48, %v646_v56  ;;  %v653_v7 = vmax.f32 %v651_v58, %v652_v63  ;;  %v683_v0 = vsel %vm639_vm3, %v1031_v5, -inf  ;;  %v464_v8 = vpop.f32.mrb[21].mxu0  ;;  %v687_v9 = vsel %vm639_vm3, %v1063_v62, -inf  ;;  %v592_v10 = vpop.f32.mrb[21].mxu1 }
 0x106   :  { %v777_v11 = vmax.f32 %v761_v60, 0.0  ;;  %v762_v1 = vadd.f32 %v1335_v48, %v667_v61  ;;  %v684_v12 = vmax.f32 %v1276_v13, %v683_v0  ;;  %v669_v22 = vsel %vm639_vm3, %v464_v8, -inf  ;;  %v1032_v23 = vpop.f32.mrb[22].mxu0  ;;  %v1064_v27 = vpop.f32.mrb[22].mxu1 }
 0x107   :  { %v775_v28 = vmax.f32 %v759_v6, 0.0  ;;  %v760_v29 = vadd.f32 %v1335_v48, %v653_v7  ;;  %v670_v32 = vmax.f32 %v1279_v14, %v669_v22  ;;  %v690_v33 = vsel %vm639_vm3, %v1032_v23, -inf  ;;  %v467_v34 = vpop.f32.mrb[23].mxu0  ;;  %v595_v35 = vpop.f32.mrb[23].mxu1 }
 0x108   :  { %v960_v37 = vpack.c.bf16 %v777_v11, %v777_v11  ;;  %v778_v38 = vmax.f32 %v762_v1, 0.0  ;;  %v686_v39 = vmax.f32 %v684_v12, %v1282_v15  ;;  %v691_v40 = vmax.f32 %v1285_v16, %v690_v33 }
 0x109   :  { %v958_v13 = vpack.c.bf16 %v775_v28, %v775_v28  ;;  %v776_v41 = vmax.f32 %v760_v29, 0.0  ;;  %v672_v42 = vmax.f32 %v670_v32, %v1288_v17  ;;  %v673_v43 = vsel %vm639_vm3, %v592_v10, -inf }
 0x10a   :  { %858 = vst.msk [vmem:[%s1488_s3 + $0x8] sm:$0xf] %vm855_vm4, %v960_v37  ;;  %v961_v14 = vpack.c.bf16 %v778_v38, %v778_v38  ;;  %v688_v44 = vmax.f32 %v686_v39, %v687_v9  ;;  %v676_v45 = vsel %vm639_vm3, %v467_v34, -inf  ;;  %v693_v49 = vmax.f32 %v691_v40, %v1294_v19 }
 0x10b   :  { %856 = vst.msk [vmem:[%s1488_s3] sm:$0xf] %vm855_vm4, %v958_v13  ;;  %v959_v15 = vpack.c.bf16 %v776_v41, %v776_v41  ;;  %v674_v16 = vmax.f32 %v672_v42, %v673_v43  ;;  %v677_v17 = vmax.f32 %v1291_v18, %v676_v45  ;;  %v694_v50 = vsel %vm639_vm3, %v1064_v27, -inf }
 0x10c   :  { %859 = vst.msk [vmem:[%s1488_s3 + $0xc] sm:$0xf] %vm855_vm4, %v961_v14  ;;  %v765_v19 = vadd.f32 %v1335_v48, %v688_v44  ;;  %v695_v54 = vmax.f32 %v693_v49, %v694_v50  ;;  %v680_v56 = vsel %vm639_vm3, %v595_v35, -inf  ;;  %v1035_v57 = vpop.f32.mrb[24].mxu0  ;;  %v1067_v58 = vpop.f32.mrb[24].mxu1  ;;  %v731_v40 = vsel %vm639_vm3, %v1263_v3, -inf }
 0x10d   :  { %857 = vst.msk [vmem:[%s1488_s3 + $0x4] sm:$0xf] %vm855_vm4, %v959_v15  ;;  %v763_v2 = vadd.f32 %v1335_v48, %v674_v16  ;;  %v679_v18 = vmax.f32 %v677_v17, %v1297_v20  ;;  %v711_v60 = vsel %vm639_vm3, %v1035_v57, -inf  ;;  %v480_v61 = vpop.f32.mrb[25].mxu0  ;;  %v715_v63 = vsel %vm639_vm3, %v1067_v58, -inf  ;;  %v608_v5 = vpop.f32.mrb[25].mxu1 }
 0x10e   :  { %v781_v62 = vmax.f32 %v765_v19, 0.0  ;;  %v766_v6 = vadd.f32 %v1335_v48, %v695_v54  ;;  %v712_v7 = vmax.f32 %v1300_v21, %v711_v60  ;;  %v697_v0 = vsel %vm639_vm3, %v480_v61, -inf  ;;  %v1036_v8 = vpop.f32.mrb[26].mxu0  ;;  %v1068_v9 = vpop.f32.mrb[26].mxu1 }
 0x10f   :  { %v779_v10 = vmax.f32 %v763_v2, 0.0  ;;  %v681_v11 = vmax.f32 %v679_v18, %v680_v56  ;;  %v698_v1 = vmax.f32 %v1303_v24, %v697_v0  ;;  %v718_v20 = vsel %vm639_vm3, %v1036_v8, -inf  ;;  %v483_v12 = vpop.f32.mrb[27].mxu0  ;;  %v611_v22 = vpop.f32.mrb[27].mxu1 }
 0x110   :  { %v964_v23 = vpack.c.bf16 %v781_v62, %v781_v62  ;;  %v782_v27 = vmax.f32 %v766_v6, 0.0  ;;  %v714_v28 = vmax.f32 %v712_v7, %v1306_v25  ;;  %v719_v29 = vmax.f32 %v1313_v30, %v718_v20 }
 0x111   :  { %v962_v32 = vpack.c.bf16 %v779_v10, %v779_v10  ;;  %v764_v21 = vadd.f32 %v1335_v48, %v681_v11  ;;  %v700_v33 = vmax.f32 %v698_v1, %v1309_v26  ;;  %v701_v34 = vsel %vm639_vm3, %v608_v5, -inf }
 0x112   :  { %862 = vst.msk [vmem:[%s1488_s3 + $0x18] sm:$0xf] %vm855_vm4, %v964_v23  ;;  %v965_v24 = vpack.c.bf16 %v782_v27, %v782_v27  ;;  %v716_v35 = vmax.f32 %v714_v28, %v715_v63  ;;  %v704_v37 = vsel %vm639_vm3, %v483_v12, -inf  ;;  %v721_v25 = vmax.f32 %v719_v29, %v1316_v31 }
 0x113   :  { %860 = vst.msk [vmem:[%s1488_s3 + $0x10] sm:$0xf] %vm855_vm4, %v962_v32  ;;  %v780_v30 = vmax.f32 %v764_v21, 0.0  ;;  %v702_v26 = vmax.f32 %v700_v33, %v701_v34  ;;  %v705_v38 = vmax.f32 %v1320_v36, %v704_v37  ;;  %v722_v39 = vsel %vm639_vm3, %v1068_v9, -inf }
 0x114   :  { %863 = vst.msk [vmem:[%s1488_s3 + $0x1c] sm:$0xf] %vm855_vm4, %v965_v24  ;;  %v769_v31 = vadd.f32 %v1335_v48, %v716_v35  ;;  %v723_v13 = vmax.f32 %v721_v25, %v722_v39  ;;  %v708_v41 = vsel %vm639_vm3, %v611_v22, -inf  ;;  %v1039_v42 = vpop.f32.mrb[28].mxu0  ;;  %v1071_v43 = vpop.f32.mrb[28].mxu1  ;;  %v734_v11 = vsel %vm639_vm3, %v1265_v4, -inf }
 0x115   :  { %v963_v14 = vpack.c.bf16 %v780_v30, %v780_v30  ;;  %v767_v36 = vadd.f32 %v1335_v48, %v702_v26  ;;  %v707_v44 = vmax.f32 %v705_v38, %v1327_v46  ;;  %v739_v45 = vsel %vm639_vm3, %v1039_v42, -inf  ;;  %v496_v3 = vpop.f32.mrb[29].mxu0  ;;  %v624_v49 = vpop.f32.mrb[29].mxu1 }
 0x116   :  { %v785_v15 = vmax.f32 %v769_v31, 0.0  ;;  %v770_v16 = vadd.f32 %v1335_v48, %v723_v13  ;;  %v740_v17 = vmax.f32 %v1330_v47, %v739_v45  ;;  %v725_v50 = vsel %vm639_vm3, %v496_v3, -inf  ;;  %v1040_v19 = vpop.f32.mrb[30].mxu0  ;;  %v1072_v54 = vpop.f32.mrb[30].mxu1 }
 0x117   :  { %861 = vst.msk [vmem:[%s1488_s3 + $0x14] sm:$0xf] %vm855_vm4, %v963_v14  ;;  %v783_v56 = vmax.f32 %v767_v36, 0.0  ;;  %v709_v46 = vmax.f32 %v707_v44, %v708_v41  ;;  %v726_v57 = vmax.f32 %v1338_v51, %v725_v50  ;;  %v743_v58 = vsel %vm639_vm3, %v1071_v43, -inf  ;;  %v499_v2 = vpop.f32.mrb[31].mxu0  ;;  %v627_v18 = vpop.f32.mrb[31].mxu1 }
 0x118   :  { %v968_v60 = vpack.c.bf16 %v785_v15, %v785_v15  ;;  %v786_v61 = vmax.f32 %v770_v16, 0.0  ;;  %v742_v47 = vmax.f32 %v740_v17, %v1341_v52  ;;  %v746_v63 = vsel %vm639_vm3, %v1040_v19, -inf }
 0x119   :  { %v966_v5 = vpack.c.bf16 %v783_v56, %v783_v56  ;;  %v768_v62 = vadd.f32 %v1335_v48, %v709_v46  ;;  %v747_v6 = vmax.f32 %v1348_v59, %v746_v63  ;;  %v728_v7 = vmax.f32 %v726_v57, %v1344_v55 }
 0x11a   :  { %866 = vst.msk [vmem:[%s1488_s3 + $0x28] sm:$0xf] %vm855_vm4, %v968_v60  ;;  %v969_v51 = vpack.c.bf16 %v786_v61, %v786_v61  ;;  %v744_v0 = vmax.f32 %v742_v47, %v743_v58  ;;  %v729_v8 = vsel %vm639_vm3, %v624_v49, -inf  ;;  %v732_v52 = vsel %vm639_vm3, %v499_v2, -inf }
 0x11b   :  { %864 = vst.msk [vmem:[%s1488_s3 + $0x20] sm:$0xf] %vm855_vm4, %v966_v5  ;;  %v784_v9 = vmax.f32 %v768_v62, 0.0  ;;  %v730_v59 = vmax.f32 %v728_v7, %v729_v8  ;;  %v733_v10 = vmax.f32 %v731_v40, %v732_v52  ;;  %v749_v55 = vmax.f32 %v747_v6, %v1379_v53 }
 0x11c   :  { %867 = vst.msk [vmem:[%s1488_s3 + $0x2c] sm:$0xf] %vm855_vm4, %v969_v51  ;;  %v773_v1 = vadd.f32 %v1335_v48, %v744_v0  ;;  %v750_v20 = vsel %vm639_vm3, %v1072_v54, -inf  ;;  %v736_v53 = vsel %vm639_vm3, %v627_v18, -inf }
 0x11d   :  { %v967_v12 = vpack.c.bf16 %v784_v9, %v784_v9  ;;  %v771_v22 = vadd.f32 %v1335_v48, %v730_v59  ;;  %v751_v23 = vmax.f32 %v749_v55, %v750_v20  ;;  %v735_v27 = vmax.f32 %v733_v10, %v734_v11 }
 0x11e   :  { %v789_v28 = vmax.f32 %v773_v1, 0.0 }
 0x11f   :  { %865 = vst.msk [vmem:[%s1488_s3 + $0x24] sm:$0xf] %vm855_vm4, %v967_v12  ;;  %v787_v4 = vmax.f32 %v771_v22, 0.0  ;;  %v774_v29 = vadd.f32 %v1335_v48, %v751_v23  ;;  %v737_v32 = vmax.f32 %v735_v27, %v736_v53 }
 0x120   :  { %v972_v21 = vpack.c.bf16 %v789_v28, %v789_v28 }
 0x121   :  { %v970_v33 = vpack.c.bf16 %v787_v4, %v787_v4  ;;  %v790_v34 = vmax.f32 %v774_v29, 0.0  ;;  %v772_v24 = vadd.f32 %v1335_v48, %v737_v32 }
 0x122   :  { %870 = vst.msk [vmem:[%s1488_s3 + $0x38] sm:$0xf] %vm855_vm4, %v972_v21 }
 0x123   :  { %868 = vst.msk [vmem:[%s1488_s3 + $0x30] sm:$0xf] %vm855_vm4, %v970_v33  ;;  %v973_v35 = vpack.c.bf16 %v790_v34, %v790_v34  ;;  %v788_v37 = vmax.f32 %v772_v24, 0.0 }
 0x125   :  { %871 = vst.msk [vmem:[%s1488_s3 + $0x3c] sm:$0xf] %vm855_vm4, %v973_v35  ;;  %v971_v25 = vpack.c.bf16 %v788_v37, %v788_v37 }
 0x127   :  { %869 = vst.msk [vmem:[%s1488_s3 + $0x34] sm:$0xf] %vm855_vm4, %v971_v25 }

// kernel: _lambda_.11
= control target key start
LH: loop header
LB: loop body
LE: loop exit
PB: predicated region body
PF: predicated region fallthrough
CT: control target
= control target key end

     0   :  { %vm91_vm0 = vcmask 293888   ;;  %vm116_vm1 = vcmask 1041408   ;;  %vm217_vm2 = vcmask 64512   ;;  %vm277_vm3 = vcmask 60416   ;;  %s458_s1 = inlined_call_operand.vmem [shape: bf16[36,8], index: 1, kind: input, shape index: {}]   ;;  %s459_s0 = inlined_call_operand.vmem [shape: bf16[4,32,36], index: 0, kind: input, shape index: {}]   ;;  %s460_s2 = inlined_call_operand.vmem [shape: f32[1,8], index: 2, kind: input, shape index: {}]   ;;  %s461_s3 = inlined_call_operand.vmem [shape: bf16[32,8], index: 3, kind: output, shape index: {}]  }
   0x1   :  { %v355_v0 = vld [vmem:[%s458_s1] sm:$0xff]   ;;  %v356_v1 = vld [vmem:[%s458_s1 + $0x8] sm:$0xff]   ;;  %v357_v2 = vld [vmem:[%s458_s1 + $0x10] ss:$0 sps:$4 sm:$0x33]  }
   0x2   :  { %325 = vmatprep.subr.bf16.mxu0 %v355_v0  ;;  %347 = vmatprep.subr.bf16.mxu1 %v355_v0  ;;  %v358_v3 = vld [vmem:[%s459_s0] sm:$0xff]   ;;  %v118_v5 = vsel %vm116_vm1, %v357_v2, 0  ;;  %v359_v6 = vld [vmem:[%s459_s0 + $0x8] sm:$0xff]   ;;  %v362_v8 = vld [vmem:[%s459_s0 + $0x10] sm:$0xff]  }
   0x3   :  { %326 = vmatpush3.bf16.msra.mxu0 %v355_v0  ;;  %350 = vmatpush3.bf16.msra.mxu1 %v355_v0  ;;  %v360_v4 = vld [vmem:[%s459_s0 + $0x20] sm:$0xff]   ;;  %v361_v7 = vld [vmem:[%s459_s0 + $0x28] sm:$0xff]   ;;  %v364_v9 = vld [vmem:[%s459_s0 + $0x30] sm:$0xff]  }
   0x4   :  { %327 = vmatprep.subr.bf16.mxu0 %v356_v1  ;;  %348 = vmatprep.subr.bf16.mxu1 %v356_v1  ;;  %v363_v10 = vld [vmem:[%s459_s0 + $0x18] sm:$0xff]   ;;  %v305_v45 = vld [vmem:[%s460_s2] ss:$0 sm:$0xff] }
   0x5   :  { %331 = vmatprep.mubr.msk.bf16.mxu0 %vm91_vm0, %v358_v3  ;;  %339 = vmatprep.mubr.msk.bf16.mxu1 %vm91_vm0, %v360_v4  ;;  %v365_v11 = vld [vmem:[%s459_s0 + $0x38] sm:$0xff]  }
   0x7   :  { %328 = vmatpush3.bf16.msra.mxu0 %v356_v1  ;;  %351 = vmatpush3.bf16.msra.mxu1 %v356_v1 }
   0x8   :  { %353 = vmatprep.subr.msk.bf16.mxu0 %vm116_vm1, %v357_v2  ;;  %354 = vmatprep.subr.msk.bf16.mxu1 %vm116_vm1, %v357_v2 }
   0xb   :  { %330 = vmatpush3.bf16.msra.mxu0 %v118_v5  ;;  %352 = vmatpush3.bf16.msra.mxu1 %v118_v5 }
   0xe   :  { %332 = vmatmul.mubr.msk.bf16.vlgmr.msra.gmra.mrb[0].mxu0 %vm91_vm0, %v359_v6  ;;  %340 = vmatmul.mubr.msk.bf16.vlgmr.msra.gmra.mrb[0].mxu1 %vm91_vm0, %v361_v7 }
   0xf   :  { %335 = vmatprep.mubr.msk.bf16.mxu0 %vm91_vm0, %v362_v8  ;;  %343 = vmatprep.mubr.msk.bf16.mxu1 %vm91_vm0, %v364_v9 }
  0x16   :  { %336 = vmatmul.mubr.msk.bf16.gmra.mrb[4].mxu0 %vm91_vm0, %v363_v10  ;;  %344 = vmatmul.mubr.msk.bf16.gmra.mrb[4].mxu1 %vm91_vm0, %v365_v11 }
  0xe1   :  { %v333_v12 = vpop.f32.mrb[0].mxu0  ;;  %v341_v13 = vpop.f32.mrb[0].mxu1 }
  0xe2   :  { %v154_v14 = vpop.f32.mrb[1].mxu0  ;;  %v186_v15 = vpop.f32.mrb[1].mxu1  ;;  %v232_v22 = vsel %vm217_vm2, %v333_v12, -inf  ;;  %v235_v24 = vsel %vm217_vm2, %v341_v13, -inf }
  0xe3   :  { %v334_v16 = vpop.f32.mrb[2].mxu0  ;;  %v342_v17 = vpop.f32.mrb[2].mxu1  ;;  %v218_v23 = vsel %vm217_vm2, %v154_v14, -inf  ;;  %v221_v29 = vsel %vm217_vm2, %v186_v15, -inf }
  0xe4   :  { %v157_v18 = vpop.f32.mrb[3].mxu0  ;;  %v189_v19 = vpop.f32.mrb[3].mxu1  ;;  %v239_v28 = vsel %vm217_vm2, %v334_v16, -inf  ;;  %v242_v44 = vsel %vm217_vm2, %v342_v17, -inf }
  0xe5   :  { %v225_v34 = vsel %vm217_vm2, %v157_v18, -inf  ;;  %v228_v48 = vsel %vm217_vm2, %v189_v19, -inf }
  0xe9   :  { %v337_v20 = vpop.f32.mrb[4].mxu0  ;;  %v345_v21 = vpop.f32.mrb[4].mxu1 }
  0xea   :  { %v233_v25 = vsel %vm217_vm2, %v337_v20, -inf  ;;  %v170_v26 = vpop.f32.mrb[5].mxu0  ;;  %v202_v27 = vpop.f32.mrb[5].mxu1  ;;  %v237_v36 = vsel %vm217_vm2, %v345_v21, -inf }
  0xeb   :  { %v234_v30 = vmax.f32 %v232_v22, %v233_v25  ;;  %v219_v31 = vsel %vm217_vm2, %v170_v26, -inf  ;;  %v338_v32 = vpop.f32.mrb[6].mxu0  ;;  %v346_v33 = vpop.f32.mrb[6].mxu1  ;;  %v223_v42 = vsel %vm217_vm2, %v202_v27, -inf }
  0xec   :  { %v220_v35 = vmax.f32 %v218_v23, %v219_v31  ;;  %v240_v37 = vsel %vm217_vm2, %v338_v32, -inf  ;;  %v173_v38 = vpop.f32.mrb[7].mxu0  ;;  %v205_v39 = vpop.f32.mrb[7].mxu1  ;;  %v244_v52 = vsel %vm217_vm2, %v346_v33, -inf }
  0xed   :  { %v236_v40 = vmax.f32 %v234_v30, %v235_v24  ;;  %v241_v41 = vmax.f32 %v239_v28, %v240_v37  ;;  %v226_v43 = vsel %vm217_vm2, %v173_v38, -inf  ;;  %v230_v56 = vsel %vm217_vm2, %v205_v39, -inf }
  0xee   :  { %v222_v46 = vmax.f32 %v220_v35, %v221_v29  ;;  %v227_v47 = vmax.f32 %v225_v34, %v226_v43 }
  0xef   :  { %v238_v49 = vmax.f32 %v236_v40, %v237_v36  ;;  %v243_v50 = vmax.f32 %v241_v41, %v242_v44 }
  0xf0   :  { %v224_v51 = vmax.f32 %v222_v46, %v223_v42  ;;  %v229_v53 = vmax.f32 %v227_v47, %v228_v48 }
  0xf1   :  { %v255_v54 = vadd.f32 %v305_v45, %v238_v49  ;;  %v245_v55 = vmax.f32 %v243_v50, %v244_v52 }
  0xf2   :  { %v253_v57 = vadd.f32 %v305_v45, %v224_v51  ;;  %v231_v58 = vmax.f32 %v229_v53, %v230_v56 }
  0xf3   :  { %v259_v59 = vmax.f32 %v255_v54, 0.0  ;;  %v256_v60 = vadd.f32 %v305_v45, %v245_v55 }
  0xf4   :  { %v257_v61 = vmax.f32 %v253_v57, 0.0  ;;  %v254_v62 = vadd.f32 %v305_v45, %v231_v58 }
  0xf5   :  { %v312_v63 = vpack.c.bf16 %v259_v59, %v259_v59  ;;  %v260_v0 = vmax.f32 %v256_v60, 0.0 }
  0xf6   :  { %v310_v1 = vpack.c.bf16 %v257_v61, %v257_v61  ;;  %v258_v2 = vmax.f32 %v254_v62, 0.0 }
  0xf7   :  { %280 = vst.msk [vmem:[%s461_s3 + $0x8] sm:$0xf] %vm277_vm3, %v312_v63  ;;  %v313_v3 = vpack.c.bf16 %v260_v0, %v260_v0 }
  0xf8   :  { %278 = vst.msk [vmem:[%s461_s3] sm:$0xf] %vm277_vm3, %v310_v1  ;;  %v311_v4 = vpack.c.bf16 %v258_v2, %v258_v2 }
  0xf9   :  { %281 = vst.msk [vmem:[%s461_s3 + $0xc] sm:$0xf] %vm277_vm3, %v313_v3 }
  0xfa   :  { %279 = vst.msk [vmem:[%s461_s3 + $0x4] sm:$0xf] %vm277_vm3, %v311_v4 }

// kernel: _lambda_.12
= control target key start
LH: loop header
LB: loop body
LE: loop exit
PB: predicated region body
PF: predicated region fallthrough
CT: control target
= control target key end

     0   :  { %vm65_vm0 = vcmask 588800   ;;  %vm72_vm1 = vcmask 1043456   ;;  %vm125_vm2 = vcmask 64512   ;;  %vm143_vm3 = vcmask 60416   ;;  %s235_s1 = inlined_call_operand.vmem [shape: bf16[72,8], index: 1, kind: input, shape index: {}]   ;;  %s236_s0 = inlined_call_operand.vmem [shape: bf16[4,8,72], index: 0, kind: input, shape index: {}]   ;;  %s237_s2 = inlined_call_operand.vmem [shape: f32[1,8], index: 2, kind: input, shape index: {}]   ;;  %s238_s3 = inlined_call_operand.vmem [shape: bf16[8,8], index: 3, kind: output, shape index: {}]  }
   0x1   :  { %v181_v0 = vld [vmem:[%s235_s1] sm:$0xff]   ;;  %v182_v1 = vld [vmem:[%s235_s1 + $0x8] sm:$0xff]   ;;  %v183_v2 = vld [vmem:[%s235_s1 + $0x10] sm:$0xff]  }
   0x2   :  { %166 = vmatprep.subr.bf16.mxu0 %v181_v0  ;;  %v186_v3 = vld [vmem:[%s236_s0] sm:$0xff]   ;;  %v184_v4 = vld [vmem:[%s235_s1 + $0x18] sm:$0xff]   ;;  %v187_v7 = vld [vmem:[%s236_s0 + $0x8] sm:$0xff]  }
   0x3   :  { %167 = vmatpush3.bf16.msra.mxu0 %v181_v0  ;;  %176 = vmatprep.mubr.msk.bf16.mxu0 %vm65_vm0, %v186_v3  ;;  %v185_v5 = vld [vmem:[%s235_s1 + $0x20] ss:$0 sps:$4 sm:$0xff]  }
   0x4   :  { %168 = vmatprep.subr.bf16.mxu0 %v182_v1  ;;  %v74_v6 = vsel %vm72_vm1, %v185_v5, 0  ;;  %v158_v18 = vld [vmem:[%s237_s2] ss:$0 sm:$0xff] }
   0x7   :  { %169 = vmatpush3.bf16.msra.mxu0 %v182_v1 }
   0x8   :  { %170 = vmatprep.subr.bf16.mxu0 %v183_v2 }
   0xb   :  { %171 = vmatpush3.bf16.msra.mxu0 %v183_v2 }
   0xc   :  { %172 = vmatprep.subr.bf16.mxu0 %v184_v4 }
   0xf   :  { %173 = vmatpush3.bf16.msra.mxu0 %v184_v4 }
  0x10   :  { %180 = vmatprep.subr.msk.bf16.mxu0 %vm72_vm1, %v185_v5 }
  0x13   :  { %175 = vmatpush3.bf16.msra.mxu0 %v74_v6 }
  0x16   :  { %177 = vmatmul.mubr.msk.bf16.vlgmr.msra.gmra.mrb[0].mxu0 %vm65_vm0, %v187_v7 }
  0xe9   :  { %v178_v8 = vpop.f32.mrb[0].mxu0 }
  0xea   :  { %v110_v9 = vpop.f32.mrb[1].mxu0  ;;  %v128_v11 = vsel %vm125_vm2, %v178_v8, -inf }
  0xeb   :  { %v179_v10 = vpop.f32.mrb[2].mxu0  ;;  %v126_v14 = vsel %vm125_vm2, %v110_v9, -inf }
  0xec   :  { %v129_v12 = vsel %vm125_vm2, %v179_v10, -inf  ;;  %v113_v13 = vpop.f32.mrb[3].mxu0 }
  0xed   :  { %v131_v15 = vmax.f32 %v128_v11, %v129_v12  ;;  %v127_v16 = vsel %vm125_vm2, %v113_v13, -inf }
  0xee   :  { %v130_v17 = vmax.f32 %v126_v14, %v127_v16 }
  0xf0   :  { %v132_v19 = vmax.f32 %v130_v17, %v131_v15 }
  0xf2   :  { %v140_v20 = vadd.f32 %v158_v18, %v132_v19 }
  0xf4   :  { %v141_v21 = vmax.f32 %v140_v20, 0.0 }
  0xf6   :  { %v142_v22 = vpack.c.bf16 %v141_v21, %v141_v21 }
  0xf8   :  { %144 = vst.msk [vmem:[%s238_s3] sm:$0xf] %vm143_vm3, %v142_v22 }

// kernel: _lambda_.13
= control target key start
LH: loop header
LB: loop body
LE: loop exit
PB: predicated region body
PF: predicated region fallthrough
CT: control target
= control target key end

     0   :  { %v213_v0 = vmov 0.0   ;;  %vm214_vm0 = vmmov 0   ;;  %v215_v2 = vmov 1966171168   ;;  %v37_v4 = vlaneseq  ;;  %s270_s1 = inlined_call_operand.vmem [shape: bf16[72,16], index: 1, kind: input, shape index: {}]   ;;  %s271_s0 = inlined_call_operand.vmem [shape: bf16[4,2,72], index: 0, kind: input, shape index: {}]   ;;  %s272_s2 = inlined_call_operand.vmem [shape: f32[1,16], index: 2, kind: input, shape index: {}]   ;;  %s273_s3 = inlined_call_operand.vmem [shape: bf16[2,16], index: 3, kind: output, shape index: {}]  }
   0x1   :  { %190 = vmatprep.subr.bf16.mxu0 %v213_v0  ;;  %v208_v1 = vld [vmem:[%s270_s1] sm:$0xff]   ;;  %200 = vmatprep.mubr.msk.bf16.mxu0 %vm214_vm0, %v213_v0  ;;  %v35_v3 = vunpack.c.l.s4 %v215_v2  ;;  %v209_v5 = vld [vmem:[%s270_s1 + $0x8] sm:$0xff]   ;;  %v210_v13 = vld [vmem:[%s270_s1 + $0x10] sm:$0xff]   ;;  %vm87_vm1 = vcmask 1043456   ;;  %vm83_vm2 = vcmask 588800   ;;  %vm153_vm3 = vcmask 123904  }
   0x2   :  { %191 = vmatpush3.bf16.msra.mxu0 %v208_v1  ;;  %v38_v7 = vshrl.u32 %v37_v4, 7  ;;  %v15_v8 = vld [vmem:[%s271_s0] sm:$0x1]  ;;  %v16_v9 = vld [vmem:[%s271_s0 + $0x1] sm:$0x1]  ;;  %v211_v18 = vld [vmem:[%s270_s1 + $0x18] sm:$0xff]  }
   0x3   :  { %v36_v6 = vunpack.c.0.s8 %v35_v3  ;;  %192 = vmatprep.subr.bf16.mxu0 %v213_v0  ;;  %v17_v10 = vld [vmem:[%s271_s0 + $0x2] sm:$0x1]  ;;  %v18_v11 = vld [vmem:[%s271_s0 + $0x3] sm:$0x1]  ;;  %v32_v14 = vcombine.low %v15_v8, %v16_v9  ;;  %v212_v19 = vld [vmem:[%s270_s1 + $0x20] ss:$0 sps:$4 sm:$0xff]  }
   0x4   :  { %v33_v15 = vcombine.low %v17_v10, %v18_v11  ;;  %v89_v21 = vsel %vm87_vm1, %v212_v19, 0  ;;  %v216_v23 = vmov 1983009808   ;;  %v183_v42 = vld [vmem:[%s272_s2] ss:$0 sm:$0xff]  ;;  %vm171_vm4 = vcmask 122880  }
   0x5   :  { %v39_v12 = vsub.s32 %v36_v6, %v38_v7  ;;  %v134_v24 = vunpack.c.l.s4 %v216_v23 }
   0x6   :  { %193 = vmatpush3.bf16.msra.mxu0 %v209_v5 }
   0x7   :  { %194 = vmatprep.subr.bf16.mxu0 %v213_v0  ;;  %v40_v16 = vrot.slane %v32_v14, %v39_v12  ;;  %v47_v17 = vrot.slane %v33_v15, %v39_v12  ;;  %v135_v25 = vunpack.c.0.s8 %v134_v24 }
   0x9   :  { %v48_v20 = vcombine.low %v40_v16, %v47_v17  ;;  %v138_v26 = vsub.s32 %v135_v25, %v38_v7 }
   0xa   :  { %195 = vmatpush3.bf16.msra.mxu0 %v210_v13 }
   0xb   :  { %196 = vmatprep.subr.bf16.mxu0 %v213_v0  ;;  %v55_v22 = vrot.slane %v48_v20, %v39_v12 }
   0xe   :  { %197 = vmatpush3.bf16.msra.mxu0 %v211_v18 }
   0xf   :  { %198 = vmatprep.subr.bf16.mxu0 %v213_v0 }
  0x12   :  { %199 = vmatpush3.bf16.msra.mxu0 %v89_v21 }
  0x15   :  { %201 = vmatmul.mubr.msk.bf16.vlgmr.msra.gmra.mrb[0].mxu0 %vm83_vm2, %v55_v22 }
  0xe8   :  { %v125_v27 = vpop.f32.mrb[0].mxu0 }
  0xe9   :  { %v132_v28 = vcombine.high %v125_v27, %v125_v27  ;;  %v139_v29 = vrot.slane %v125_v27, %v138_v26  ;;  %v202_v30 = vpop.f32.mrb[1].mxu0 }
  0xea   :  { %v128_v31 = vpop.f32.mrb[2].mxu0 }
  0xeb   :  { %v146_v32 = vrot.slane %v132_v28, %v138_v26  ;;  %v147_v33 = vcombine.high %v139_v29, %v139_v29  ;;  %v203_v34 = vpop.f32.mrb[3].mxu0  ;;  %v154_v37 = vsel %vm153_vm3, %v139_v29, -inf }
  0xed   :  { %v148_v35 = vcombine.high %v146_v32, %v146_v32  ;;  %v155_v36 = vsel %vm153_vm3, %v147_v33, -inf  ;;  %v156_v38 = vsel %vm153_vm3, %v146_v32, -inf }
  0xee   :  { %v158_v40 = vmax.f32 %v154_v37, %v155_v36 }
  0xef   :  { %v157_v39 = vsel %vm153_vm3, %v148_v35, -inf }
  0xf0   :  { %v159_v41 = vmax.f32 %v156_v38, %v157_v39 }
  0xf2   :  { %v160_v43 = vmax.f32 %v158_v40, %v159_v41 }
  0xf4   :  { %v168_v44 = vadd.f32 %v183_v42, %v160_v43 }
  0xf6   :  { %v169_v45 = vmax.f32 %v168_v44, 0.0 }
  0xf8   :  { %v170_v46 = vpack.c.bf16 %v169_v45, %v169_v45 }
  0xfa   :  { %172 = vst.msk [vmem:[%s273_s3] sm:$0x1] %vm171_vm4, %v170_v46 }

// kernel: _lambda_.14
= control target key start
LH: loop header
LB: loop body
LE: loop exit
PB: predicated region body
PF: predicated region fallthrough
CT: control target
= control target key end

     0   :  { %v101_v0 = vmov 0.0   ;;  %vm102_vm0 = vmmov 0   ;;  %vm34_vm1 = vcmask 130048   ;;  %vm81_vm2 = vcmask 516096   ;;  %s143_s1 = inlined_call_operand.vmem [shape: bf16[16,64], index: 1, kind: input, shape index: {}]   ;;  %s144_s0 = inlined_call_operand.vmem [shape: bf16[2,16], index: 0, kind: input, shape index: {}]   ;;  %s145_s2 = inlined_call_operand.vmem [shape: f32[1,64], index: 2, kind: input, shape index: {}]   ;;  %s146_s3 = inlined_call_operand.vmem [shape: f32[2,64], index: 3, kind: input, shape index: {}]   ;;  %s147_s4 = inlined_call_operand.vmem [shape: bf16[2,64], index: 4, kind: output, shape index: {}]  }
   0x1   :  { %92 = vmatprep.subr.bf16.mxu0 %v101_v0  ;;  %v100_v1 = vld [vmem:[%s143_s1] sm:$0xff]   ;;  %94 = vmatprep.mubr.msk.bf16.mxu0 %vm102_vm0, %v101_v0 }
   0x2   :  { %93 = vmatpush3.bf16.msra.mxu0 %v100_v1  ;;  %v18_v2 = vld [vmem:[%s144_s0] sm:$0x1] }
   0x3   :  { %v87_v3 = vld [vmem:[%s145_s2] ss:$0 sm:$0xff] }
   0x4   :  { %v78_v5 = vld [vmem:[%s146_s3] sm:$0x3] }
   0x5   :  { %95 = vmatmul.mubr.msk.bf16.vlgmr.msra.gmra.mrb[0].mxu0 %vm34_vm1, %v18_v2 }
  0xd8   :  { %v72_v4 = vpop.f32.mrb[0].mxu0 }
  0xd9   :  { %v73_v6 = vadd.f32 %v87_v3, %v72_v4  ;;  %v96_v7 = vpop.f32.mrb[1].mxu0 }
  0xda   :  { %v75_v8 = vpop.f32.mrb[2].mxu0 }
  0xdb   :  { %v79_v9 = vadd.f32 %v78_v5, %v73_v6  ;;  %v97_v10 = vpop.f32.mrb[3].mxu0 }
  0xdd   :  { %v80_v11 = vpack.c.bf16 %v79_v9, %v79_v9 }
  0xdf   :  { %82 = vst.msk [vmem:[%s147_s4] sm:$0x1] %vm81_vm2, %v80_v11 }

// kernel: _lambda_.15
= control target key start
LH: loop header
LB: loop body
LE: loop exit
PB: predicated region body
PF: predicated region fallthrough
CT: control target
= control target key end

     0   :  { %v871_v1 = vmov 0   ;;  %vm88_vm0 = vcmask 523264   ;;  %v38_v10 = vlaneseq  ;;  %v872_v12 = vmov 0.0   ;;  %s875_s20 = smov 64   ;;  %s877_s21 = smov 112   ;;  %s1057_s1 = inlined_call_operand.vmem [shape: bf16[64,192], index: 1, kind: input, shape index: {}]   ;;  %s1058_s0 = inlined_call_operand.vmem [shape: bf16[2,64], index: 0, kind: input, shape index: {}]   ;;  %s1059_s2 = inlined_call_operand.vmem [shape: f32[1,192], index: 2, kind: input, shape index: {}]   ;;  %s1060_s3 = inlined_call_operand.vmem [shape: bf16[64,64], index: 3, kind: input, shape index: {}]   ;;  %s1061_s4 = inlined_call_operand.vmem [shape: f32[1,64], index: 4, kind: input, shape index: {}]   ;;  %s1062_s5 = inlined_call_operand.vmem [shape: f32[1,64], index: 5, kind: input, shape index: {}]   ;;  %s1063_s6 = inlined_call_operand.vmem [shape: f32[1,64], index: 6, kind: input, shape index: {}]   ;;  %s1064_s7 = inlined_call_operand.vmem [shape: bf16[2,64], index: 7, kind: output, shape index: {}]  }
   0x1   :  { %v837_v0 = vld [vmem:[%s1057_s1 + $0x4] ss:$8 sps:$4 sm:$0xff]   ;;  %124 = vmatprep.mubr.bf16.mxu0 %v871_v1  ;;  %v839_v2 = vld [vmem:[%s1057_s1] ss:$8 sps:$4 sm:$0xff]   ;;  %v840_v3 = vld [vmem:[%s1057_s1 + $0x14] ss:$8 sps:$4 sm:$0xff]   ;;  %767 = vmatprep.subr.bf16.mxu1 %v872_v12 }
   0x2   :  { %92 = vmatprep.subr.bf16.mxu0 %v837_v0  ;;  %v842_v4 = vld [vmem:[%s1057_s1 + $0x10] ss:$8 sps:$4 sm:$0xff]   ;;  %v843_v5 = vld [vmem:[%s1057_s1 + $0x24] ss:$8 sps:$4 sm:$0xff]   ;;  %v845_v6 = vld [vmem:[%s1057_s1 + $0x20] ss:$8 sps:$4 sm:$0xff]  }
   0x3   :  { %93 = vmatpush1.bf16.msra.mxu0 %v839_v2  ;;  %v846_v7 = vld [vmem:[%s1057_s1 + $0x34] ss:$8 sps:$4 sm:$0xff]   ;;  %v848_v8 = vld [vmem:[%s1057_s1 + $0x30] ss:$8 sps:$4 sm:$0xff]   ;;  %v948_v9 = vld [vmem:[%s1058_s0] sm:$0x1] }
   0x4   :  { %94 = vmatprep.subr.bf16.mxu0 %v840_v3  ;;  %v39_v11 = vshrl.u32 %v38_v10, 7  ;;  %v36_v14 = vld [vmem:[%s1059_s2] sm:$0x3]  ;;  %vm873_vm1 = vmmov 0   ;;  %s874_s0 = smov 48   ;;  %vm138_vm2 = vcmask 130048  }
   0x5   :  { %769 = vmatprep.mubr.msk.bf16.mxu1 %vm873_vm1, %v872_v12  ;;  %vm203_vm3 = vcmask 1040384   ;;  %vm186_vm4 = vcmask 9216   ;;  %s876_s2 = smov 80   ;;  %s878_s22 = smov 32   ;;  %vm199_vm5 = vcmask 15360   ;;  %vm594_vm6 = vcmask 261120  }
   0x6   :  { %v40_v13 = vsub.s32 0, %v39_v11  ;;  %v44_v22 = vsub.s32 1, %v39_v11  ;;  %s879_s23 = smov 96   ;;  %s880_s24 = smov 16   ;;  %vm596_vm7 = vcmask 392192   ;;  %vm683_vm8 = vcmask 517120  }
   0x7   :  { %95 = vmatpush1.bf16.msra.mxu0 %v842_v4  ;;  %vm715_vm9 = vcmask 516096  }
   0x8   :  { %96 = vmatprep.subr.bf16.mxu0 %v843_v5  ;;  %v41_v15 = vrot.slane %v36_v14, %v40_v13  ;;  %v45_v23 = vrot.slane %v36_v14, %v44_v22 }
   0xb   :  { %97 = vmatpush1.bf16.msra.mxu0 %v845_v6 }
   0xc   :  { %98 = vmatprep.subr.bf16.mxu0 %v846_v7 }
   0xf   :  { %99 = vmatpush1.bf16.msra.mxu0 %v848_v8 }
  0x10   :  { %791 = vmatprep.subr.bf16.mxu0 %v872_v12 }
  0x12   :  { %729 = vmatmul.mubr.msk.bf16.vlgmr.msra.gmra.mrb[0].mxu0 %vm88_vm0, %v948_v9 }
  0x13   :  { %793 = vmatprep.mubr.msk.bf16.mxu0 %vm873_vm1, %v872_v12 }
  0xe5   :  { %v126_v16 = vpop.f32.mrb[0].mxu0 }
  0xe6   :  { %v127_v17 = vadd.f32 %v126_v16, %v41_v15  ;;  %v128_v18 = vpop.f32.mrb[1].mxu0 }
  0xe7   :  { %v130_v19 = vpop.f32.mrb[2].mxu0  ;;  %v129_v25 = vadd.f32 %v128_v18, %v45_v23 }
  0xe8   :  { %v133_v20 = vpack.c.bf16 %v127_v17, %v127_v17  ;;  %v131_v21 = vpop.f32.mrb[3].mxu0 }
  0xe9   :  { %v964_v27 = vpack.c.bf16 %v129_v25, %v129_v25 }
  0xea   :  { %249 = vrot.lane.b32.xlu1 %v133_v20, %s874_s0  ;;  %136 = vrot.lane.b32.xlu0 %v133_v20, %s875_s20 }
  0xeb   :  { %v205_v28 = vsel %vm203_vm3, %v964_v27, 0 }
 0x15c   :  { %v137_v24 = vpop.permute.xlu0 %136  ;;  %v250_v40 = vpop.permute.xlu1 %249 }
 0x15d   :  { %v143_v26 = vsel %vm138_vm2, %v137_v24, 0  ;;  %v255_v49 = vsel %vm138_vm2, %v250_v40, 0 }
 0x15e   :  { %768 = vmatpush3.bf16.xpose.msra.mxu1 %v143_v26 }
 0x15f   :  { %773 = vmatprep.subr.bf16.mxu1 %v872_v12 }
 0x165   :  { %770 = vmatmul.mubr.msk.bf16.vlgmr.msra.gmra.mrb[0].mxu1 %vm138_vm2, %v133_v20 }
 0x166   :  { %774 = vmatpush3.bf16.msra.mxu1 %v205_v28  ;;  %775 = vmatprep.mubr.msk.bf16.mxu1 %vm873_vm1, %v872_v12 }
 0x167   :  { %779 = vmatprep.subr.bf16.mxu1 %v872_v12 }
 0x238   :  { %v179_v29 = vpop.f32.mrb[0].mxu1 }
 0x239   :  { %v185_v30 = vmul.f32 0.25, %v179_v29  ;;  %v771_v31 = vpop.f32.mrb[1].mxu1 }
 0x23a   :  { %v182_v32 = vpop.f32.mrb[2].mxu1 }
 0x23b   :  { %v772_v33 = vpop.f32.mrb[3].mxu1  ;;  %v187_v34 = vsel %vm186_vm4, %v185_v30, -inf }
 0x23c   :  { %188 = vmax.xlane.f32.xlu0 %v187_v34 }
 0x252   :  { %470 = vrot.lane.b32.xlu0 %v133_v20, %s876_s2 }
 0x2c9   :  { %v189_v35 = vpop.xlane.xlu0 %188 }
 0x2ca   :  { %v190_v36 = vsub.f32 %v185_v30, %v189_v35 }
 0x2cc   :  { %v191_v37 = vmul.f32 1.442695, %v190_v36 }
 0x2cd   :  { %v471_v52 = vpop.permute.xlu0 %470 }
 0x2ce   :  { %853 = vpow2.f32 %v191_v37 }
 0x2d8   :  { %v854_v38 = vpop.eup %853 }
 0x2d9   :  { %v193_v39 = vsel %vm186_vm4, %v854_v38, 0.0 }
 0x2da   :  { %194 = vadd.xlane.f32.xlu1 %v193_v39 }
 0x2eb   :  { %247 = vrot.lane.b32.xlu1 %v133_v20, %s877_s21 }
 0x2ef   :  { %361 = vrot.lane.b32.xlu1 %v133_v20, %s878_s22 }
 0x2f3   :  { %359 = vrot.lane.b32.xlu1 %v133_v20, %s879_s23 }
 0x2f7   :  { %472 = vrot.lane.b32.xlu1 %v133_v20, %s880_s24 }
 0x367   :  { %v195_v41 = vpop.xlane.xlu1 %194 }
 0x368   :  { %855 = vrcp.f32 %v195_v41 }
 0x36b   :  { %v248_v42 = vpop.permute.xlu1 %247 }
 0x36f   :  { %v362_v43 = vpop.permute.xlu1 %361 }
 0x370   :  { %v367_v44 = vsel %vm138_vm2, %v362_v43, 0 }
 0x371   :  { %792 = vmatpush3.bf16.xpose.msra.mxu0 %v367_v44 }
 0x372   :  { %v856_v45 = vpop.eup %855  ;;  %803 = vmatprep.subr.bf16.mxu0 %v872_v12 }
 0x373   :  { %v197_v46 = vmul.f32 %v856_v45, %v854_v38  ;;  %v360_v47 = vpop.permute.xlu1 %359 }
 0x375   :  { %v198_v48 = vpack.c.bf16 %v197_v46, %v197_v46  ;;  %v849_v46 = vld [vmem:[%s1060_s3] sm:$0xff]  }
 0x377   :  { %776 = vmatmul.mubr.msk.bf16.vlgmr.msra.gmra.mrb[4].mxu1 %vm199_vm5, %v198_v48  ;;  %v473_v50 = vpop.permute.xlu1 %472  ;;  %v851_v48 = vld [vmem:[%s1060_s3 + $0x10] sm:$0xff]  }
 0x378   :  { %780 = vmatpush3.bf16.xpose.msra.mxu1 %v255_v49  ;;  %v478_v51 = vsel %vm138_vm2, %v473_v50, 0  ;;  %794 = vmatmul.mubr.msk.bf16.vlgmr.msra.gmra.mrb[4].mxu0 %vm138_vm2, %v360_v47  ;;  %v850_v47 = vld [vmem:[%s1060_s3 + $0x8] sm:$0xff]  }
 0x379   :  { %804 = vmatpush3.bf16.xpose.msra.mxu0 %v478_v51  ;;  %781 = vmatprep.mubr.msk.bf16.mxu1 %vm873_vm1, %v872_v12 }
 0x37a   :  { %805 = vmatprep.mubr.msk.bf16.mxu0 %vm873_vm1, %v872_v12  ;;  %785 = vmatprep.subr.bf16.mxu1 %v872_v12 }
 0x37b   :  { %815 = vmatprep.subr.bf16.mxu0 %v872_v12 }
 0x37f   :  { %782 = vmatmul.mubr.msk.bf16.vlgmr.msra.gmra.mrb[8].mxu1 %vm138_vm2, %v248_v42 }
 0x380   :  { %806 = vmatmul.mubr.msk.bf16.vlgmr.msra.gmra.mrb[8].mxu0 %vm138_vm2, %v471_v52  ;;  %787 = vmatprep.mubr.msk.bf16.mxu1 %vm873_vm1, %v872_v12 }
 0x381   :  { %823 = vmatprep.mubr.msk.bf16.mxu0 %vm873_vm1, %v872_v12  ;;  %816 = vmatpush3.bf16.msra.mxu0 %v849_v46 }
 0x382   :  { %817 = vmatprep.subr.bf16.mxu0 %v872_v12 }
 0x385   :  { %818 = vmatpush3.bf16.msra.mxu0 %v850_v47 }
 0x386   :  { %819 = vmatprep.subr.bf16.mxu0 %v872_v12 }
 0x389   :  { %820 = vmatpush3.bf16.msra.mxu0 %v851_v48 }
 0x38a   :  { %821 = vmatprep.subr.bf16.mxu0 %v872_v12 }
 0x44a   :  { %v997_v53 = vpop.f32.mrb[4].mxu1 }
 0x44b   :  { %v777_v54 = vpop.f32.mrb[5].mxu1  ;;  %v403_v55 = vpop.f32.mrb[4].mxu0 }
 0x44c   :  { %v409_v56 = vmul.f32 0.25, %v403_v55  ;;  %v244_v57 = vpop.f32.mrb[6].mxu1  ;;  %v795_v58 = vpop.f32.mrb[5].mxu0  ;;  %v852_v54 = vld [vmem:[%s1060_s3 + $0x18] sm:$0xff]  }
 0x44d   :  { %v778_v59 = vpop.f32.mrb[7].mxu1  ;;  %v406_v60 = vpop.f32.mrb[6].mxu0  ;;  %822 = vmatpush3.bf16.msra.mxu0 %v852_v54 }
 0x44e   :  { %v796_v61 = vpop.f32.mrb[7].mxu0  ;;  %v410_v62 = vsel %vm186_vm4, %v409_v56, -inf }
 0x44f   :  { %411 = vmax.xlane.f32.xlu0 %v410_v62 }
 0x452   :  { %v291_v63 = vpop.f32.mrb[8].mxu1 }
 0x453   :  { %v297_v0 = vmul.f32 0.25, %v291_v63  ;;  %v783_v1 = vpop.f32.mrb[9].mxu1  ;;  %v514_v2 = vpop.f32.mrb[8].mxu0 }
 0x454   :  { %v294_v3 = vpop.f32.mrb[10].mxu1  ;;  %v807_v4 = vpop.f32.mrb[9].mxu0  ;;  %v520_v5 = vmul.f32 0.25, %v514_v2 }
 0x455   :  { %v784_v6 = vpop.f32.mrb[11].mxu1  ;;  %v517_v7 = vpop.f32.mrb[10].mxu0  ;;  %v298_v8 = vsel %vm186_vm4, %v297_v0, -inf }
 0x456   :  { %v808_v10 = vpop.f32.mrb[11].mxu0  ;;  %299 = vmax.xlane.f32.xlu1 %v298_v8  ;;  %v521_v11 = vsel %vm186_vm4, %v520_v5, -inf  ;;  %v681_v6 = vunpack.c.l.bf16 %v948_v9 }
 0x45a   :  { %522 = vmax.xlane.f32.xlu1 %v521_v11 }
 0x465   :  { %311 = vrot.lane.b32.xlu0 %v964_v27, %s877_s21 }
 0x4dc   :  { %v412_v13 = vpop.xlane.xlu0 %411 }
 0x4dd   :  { %v413_v14 = vsub.f32 %v409_v56, %v412_v13 }
 0x4df   :  { %v414_v15 = vmul.f32 1.442695, %v413_v14 }
 0x4e0   :  { %v312_v16 = vpop.permute.xlu0 %311 }
 0x4e1   :  { %857 = vpow2.f32 %v414_v15  ;;  %v317_v17 = vsel %vm203_vm3, %v312_v16, 0 }
 0x4e2   :  { %786 = vmatpush3.bf16.msra.mxu1 %v317_v17 }
 0x4e3   :  { %v300_v18 = vpop.xlane.xlu1 %299  ;;  %797 = vmatprep.subr.bf16.mxu1 %v872_v12 }
 0x4e4   :  { %v301_v19 = vsub.f32 %v297_v0, %v300_v18 }
 0x4e6   :  { %v302_v22 = vmul.f32 1.442695, %v301_v19 }
 0x4e7   :  { %v523_v20 = vpop.xlane.xlu1 %522 }
 0x4e8   :  { %v524_v21 = vsub.f32 %v520_v5, %v523_v20  ;;  %v738_v5 = vld [vmem:[%s1061_s4] ss:$0 sm:$0xff] }
 0x4ea   :  { %v525_v23 = vmul.f32 1.442695, %v524_v21 }
 0x4eb   :  { %v858_v24 = vpop.eup %857 }
 0x4ec   :  { %859 = vpow2.f32 %v525_v23  ;;  %v416_v25 = vsel %vm186_vm4, %v858_v24, 0.0  ;;  %v744_v23 = vld [vmem:[%s1062_s5] ss:$0 sm:$0xff] }
 0x4ed   :  { %417 = vadd.xlane.f32.xlu1 %v416_v25  ;;  %861 = vpow2.f32 %v302_v22  ;;  %v745_v25 = vld [vmem:[%s1063_s6] ss:$0 sm:$0xff] }
 0x4f6   :  { %v860_v26 = vpop.eup %859 }
 0x4f7   :  { %v527_v28 = vsel %vm186_vm4, %v860_v26, 0.0  ;;  %v862_v29 = vpop.eup %861 }
 0x4f8   :  { %528 = vadd.xlane.f32.xlu1 %v527_v28  ;;  %v304_v30 = vsel %vm186_vm4, %v862_v29, 0.0 }
 0x4fc   :  { %305 = vadd.xlane.f32.xlu1 %v304_v30 }
 0x50d   :  { %422 = vrot.lane.b32.xlu1 %v964_v27, %s879_s23 }
 0x511   :  { %533 = vrot.lane.b32.xlu1 %v964_v27, %s876_s2 }
 0x57a   :  { %v418_v31 = vpop.xlane.xlu1 %417 }
 0x585   :  { %v529_v32 = vpop.xlane.xlu1 %528 }
 0x589   :  { %v306_v33 = vpop.xlane.xlu1 %305 }
 0x58a   :  { %863 = vrcp.f32 %v306_v33 }
 0x58b   :  { %865 = vrcp.f32 %v418_v31 }
 0x58c   :  { %867 = vrcp.f32 %v529_v32 }
 0x58d   :  { %v423_v36 = vpop.permute.xlu1 %422 }
 0x58e   :  { %v428_v39 = vsel %vm203_vm3, %v423_v36, 0 }
 0x591   :  { %v534_v40 = vpop.permute.xlu1 %533 }
 0x592   :  { %v539_v43 = vsel %vm203_vm3, %v534_v40, 0 }
 0x594   :  { %v864_v34 = vpop.eup %863 }
 0x595   :  { %v308_v35 = vmul.f32 %v864_v34, %v862_v29  ;;  %v866_v38 = vpop.eup %865 }
 0x596   :  { %v420_v27 = vmul.f32 %v866_v38, %v858_v24  ;;  %v868_v42 = vpop.eup %867 }
 0x597   :  { %v309_v37 = vpack.c.bf16 %v308_v35, %v308_v35  ;;  %v531_v44 = vmul.f32 %v868_v42, %v860_v26 }
 0x598   :  { %v421_v41 = vpack.c.bf16 %v420_v27, %v420_v27 }
 0x599   :  { %788 = vmatmul.mubr.msk.bf16.vlgmr.msra.gmra.mrb[12].mxu1 %vm199_vm5, %v309_v37  ;;  %v532_v45 = vpack.c.bf16 %v531_v44, %v531_v44 }
 0x59a   :  { %798 = vmatpush3.bf16.msra.mxu1 %v428_v39  ;;  %799 = vmatprep.mubr.msk.bf16.mxu1 %vm873_vm1, %v872_v12 }
 0x59b   :  { %809 = vmatprep.subr.bf16.mxu1 %v872_v12 }
 0x5a1   :  { %800 = vmatmul.mubr.msk.bf16.vlgmr.msra.gmra.mrb[16].mxu1 %vm199_vm5, %v421_v41 }
 0x5a2   :  { %810 = vmatpush3.bf16.msra.mxu1 %v539_v43  ;;  %811 = vmatprep.mubr.msk.bf16.mxu1 %vm873_vm1, %v872_v12 }
 0x5a9   :  { %812 = vmatmul.mubr.msk.bf16.vlgmr.msra.gmra.mrb[20].mxu1 %vm199_vm5, %v532_v45 }
 0x66c   :  { %v353_v49 = vpop.f32.mrb[12].mxu1 }
 0x66d   :  { %582 = vrot.lane.b32.xlu0 %v353_v49, %s880_s24  ;;  %v789_v50 = vpop.f32.mrb[13].mxu1 }
 0x66e   :  { %v356_v51 = vpop.f32.mrb[14].mxu1 }
 0x66f   :  { %v790_v52 = vpop.f32.mrb[15].mxu1 }
 0x674   :  { %v464_v55 = vpop.f32.mrb[16].mxu1 }
 0x675   :  { %586 = vrot.lane.b32.xlu1 %v464_v55, %s878_s22  ;;  %v801_v56 = vpop.f32.mrb[17].mxu1 }
 0x676   :  { %v467_v57 = vpop.f32.mrb[18].mxu1 }
 0x677   :  { %v802_v58 = vpop.f32.mrb[19].mxu1 }
 0x67c   :  { %v575_v59 = vpop.f32.mrb[20].mxu1 }
 0x67d   :  { %590 = vrot.lane.b32.xlu0 %v575_v59, %s874_s0  ;;  %v813_v60 = vpop.f32.mrb[21].mxu1 }
 0x67e   :  { %v578_v61 = vpop.f32.mrb[22].mxu1 }
 0x67f   :  { %v814_v62 = vpop.f32.mrb[23].mxu1 }
 0x6df   :  { %v583_v63 = vpop.permute.xlu0 %582 }
 0x6e0   :  { %v593_v0 = vsel %vm138_vm2, %v997_v53, %v583_v63 }
 0x6e7   :  { %v587_v12 = vpop.permute.xlu1 %586 }
 0x6e8   :  { %v595_v1 = vsel %vm594_vm6, %v593_v0, %v587_v12 }
 0x6ef   :  { %v591_v2 = vpop.permute.xlu0 %590 }
 0x6f0   :  { %v597_v3 = vsel %vm596_vm7, %v595_v1, %v591_v2 }
 0x6f1   :  { %v598_v4 = vpack.c.bf16 %v597_v3, %v597_v3 }
 0x6f3   :  { %824 = vmatmul.mubr.msk.bf16.vlgmr.msra.gmra.mrb[12].mxu0 %vm88_vm0, %v598_v4 }
 0x7c6   :  { %v675_v7 = vpop.f32.mrb[12].mxu0 }
 0x7c7   :  { %v676_v8 = vadd.f32 %v738_v5, %v675_v7  ;;  %v825_v10 = vpop.f32.mrb[13].mxu0 }
 0x7c8   :  { %v678_v11 = vpop.f32.mrb[14].mxu0 }
 0x7c9   :  { %v826_v13 = vpop.f32.mrb[15].mxu0  ;;  %v682_v14 = vadd.f32 %v681_v6, %v676_v8 }
 0x7cb   :  { %v684_v53 = vsel %vm683_vm8, %v682_v14, 0.0 }
 0x7cc   :  { %685 = vadd.xlane.f32.xlu1 %v684_v53 }
 0x859   :  { %v686_v15 = vpop.xlane.xlu1 %685 }
 0x85a   :  { %v688_v16 = vmul.f32 0.015625, %v686_v15 }
 0x85c   :  { %v689_v17 = vsub.f32 %v682_v14, %v688_v16 }
 0x85e   :  { %v690_v18 = vmul.f32 %v689_v17, %v689_v17 }
 0x860   :  { %v691_v19 = vsel %vm683_vm8, %v690_v18, 0.0 }
 0x861   :  { %692 = vadd.xlane.f32.xlu0 %v691_v19 }
 0x8ee   :  { %v693_v20 = vpop.xlane.xlu0 %692 }
 0x8ef   :  { %v694_v21 = vmul.f32 0.015625, %v693_v20 }
 0x8f1   :  { %v695_v22 = vadd.f32 1e-05, %v694_v21 }
 0x8f3   :  { %869 = vrsqrt.f32 %v695_v22 }
 0x8fd   :  { %v870_v9 = vpop.eup %869 }
 0x8fe   :  { %v697_v24 = vmul.f32 %v870_v9, %v689_v17 }
 0x900   :  { %v705_v26 = vmul.f32 %v744_v23, %v697_v24 }
 0x902   :  { %v713_v28 = vadd.f32 %v745_v25, %v705_v26 }
 0x904   :  { %v714_v29 = vpack.c.bf16 %v713_v28, %v713_v28 }
 0x906   :  { %716 = vst.msk [vmem:[%s1064_s7] sm:$0x1] %vm715_vm9, %v714_v29 }

// kernel: _lambda_.19
= control target key start
LH: loop header
LB: loop body
LE: loop exit
PB: predicated region body
PF: predicated region fallthrough
CT: control target
= control target key end

     0   :  { %v181_v1 = vmov 0.0   ;;  %vm182_vm0 = vmmov 0   ;;  %s234_s0 = inlined_call_operand.vmem [shape: bf16[2,64], index: 0, kind: input, shape index: {}]   ;;  %s235_s1 = inlined_call_operand.vmem [shape: bf16[64,2], index: 1, kind: input, shape index: {}]   ;;  %s236_s2 = inlined_call_operand.vmem [shape: f32[1,2], index: 2, kind: input, shape index: {}]   ;;  %s237_s3 = inlined_call_operand.hbm [shape: f32[2,2], index: 3, kind: output, shape index: {}]  }
   0x1   :  { %v149_v0 = vld [vmem:[%s235_s1] sm:$0xff]   ;;  %134 = vmatprep.subr.bf16.mxu0 %v181_v1  ;;  %v150_v2 = vld [vmem:[%s235_s1 + $0x8] sm:$0xff]   ;;  %142 = vmatprep.mubr.msk.bf16.mxu0 %vm182_vm0, %v181_v1 }
   0x2   :  { %135 = vmatpush3.bf16.msra.mxu0 %v149_v0 }
   0x3   :  { %136 = vmatprep.subr.bf16.mxu0 %v181_v1 }
   0x4   :  { %8 = vsyncpa [#allocation3], 0  ;;  %v151_v3 = vld [vmem:[%s235_s1 + $0x10] sm:$0xff]   ;;  %v152_v4 = vld [vmem:[%s235_s1 + $0x18] sm:$0xff]   ;;  %vm56_vm1 = vcmask 523264   ;;  %s183_s1 = smov [#allocation2]  }
   0x5   :  { %v16_v5 = vld [vmem:[%s234_s0] sm:$0x1]  ;;  %s115_s0 = sshll.u32 %s183_s1, 4  ;;  %vm107_vm2 = vcmask 9216   ;;  %s116_s0 = int_to_ptr.vmem [resolvable:$true] %s115_s0 }
   0x6   :  { %137 = vmatpush3.bf16.msra.mxu0 %v150_v2  ;;  %v123_v6 = vld [vmem:[%s236_s2] ss:$0 sm:$0xff]  ;;  %s157_s2 = scalar_lea.vmem %s116_s0, 32  ;;  %p162_p1 = scmp.lt.s32.totalorder %s116_s0, %s116_s0 }
   0x7   :  { %138 = vmatprep.subr.bf16.mxu0 %v181_v1  ;;  %p158_p0 = scmp.ne.s32.totalorder %s116_s0, %s157_s2  ;;  %p163_p2 = scmp.lt.s32.totalorder %s157_s2, %s157_s2 }
   0x9   :  { %p164_p3 = por %p163_p2, %p162_p1 }
   0xa   :  { %139 = vmatpush3.bf16.msra.mxu0 %v151_v3 }
   0xb   :  { %140 = vmatprep.subr.bf16.mxu0 %v181_v1  ;;  %p165_p4 = pnand %p164_p3, %p158_p0 }
   0xe   :  { %141 = vmatpush3.bf16.msra.mxu0 %v152_v4 }
  0x11   :  { %143 = vmatmul.mubr.msk.bf16.vlgmr.msra.gmra.mrb[0].mxu0 %vm56_vm1, %v16_v5 }
  0xe4   :  { %v94_v7 = vpop.f32.mrb[0].mxu0 }
  0xe5   :  { %v95_v8 = vadd.f32 %v123_v6, %v94_v7  ;;  %v144_v9 = vpop.f32.mrb[1].mxu0 }
  0xe6   :  { %v97_v10 = vpop.f32.mrb[2].mxu0 }
  0xe7   :  { %v100_v11 = vsub.f32 0.0, %v95_v8  ;;  %v145_v12 = vpop.f32.mrb[3].mxu0 }
  0xe9   :  { %v101_v13 = vmul.f32 1.442695, %v100_v11 }
  0xeb   :  { %153 = vpow2.f32 %v101_v13 }
  0xf5   :  { %v154_v14 = vpop.eup %153 }
  0xf6   :  { %v103_v15 = vadd.f32 1.0, %v154_v14 }
  0xf8   :  { %155 = vrcp.f32 %v103_v15 }
 0x102   :  { %v156_v16 = vpop.eup %155 }
 0x103   :  { %v105_v17 = vmax.f32 %v156_v16, 0.0 }
 0x105   :  { %v106_v18 = vmin.f32 %v105_v17, 1.0 }
 0x107   :  { %108 = vst.msk [vmem:[#allocation2] sm:$0x3] %vm107_vm2, %v106_v18 }
 0x108   :  { %168 = shalt.err (!%p165_p4)
}
 0x109   :  { %s169_s26 = scalar_lea.hbm %s237_s3, 32 }
 0x10a   :  { %p170_p5 = scmp.ne.s32.totalorder %s237_s3, %s169_s26  ;;  %p173_p6 = scmp.lt.u32.totalorder %s169_s26, %s237_s3 }
 0x10c   :  { %p175_p7 = pnand %p173_p6, %p170_p5 }
 0x10e   :  { %178 = shalt.err (!%p175_p7)
}
 0x10f   :  { %118 = dma.vmem_to_hbm [thread:$0]  %s116_s0, 32, %s237_s3, [#allocation3]  }
 0x110   :  { %179 = dma.done.wait [#allocation3], 32  }
 0x111   :  { %180 = vsyncadd [#allocation3], 4294967264 }
 0x112   :  { %122 = vsyncpa [#allocation3], 1 }

// kernel: _lambda_.16
= control target key start
LH: loop header
LB: loop body
LE: loop exit
PB: predicated region body
PF: predicated region fallthrough
CT: control target
= control target key end

     0   :  { %v433_v1 = vmov 0   ;;  %vm88_vm0 = vcmask 523264   ;;  %v38_v26 = vlaneseq  ;;  %vm314_vm1 = vcmask 517120   ;;  %s564_s1 = inlined_call_operand.vmem [shape: bf16[64,256], index: 1, kind: input, shape index: {}]   ;;  %s565_s3 = inlined_call_operand.vmem [shape: bf16[256,64], index: 3, kind: input, shape index: {}]   ;;  %s566_s0 = inlined_call_operand.vmem [shape: bf16[2,64], index: 0, kind: input, shape index: {}]   ;;  %s567_s2 = inlined_call_operand.vmem [shape: f32[1,256], index: 2, kind: input, shape index: {}]   ;;  %s568_s4 = inlined_call_operand.vmem [shape: f32[1,64], index: 4, kind: input, shape index: {}]   ;;  %s569_s5 = inlined_call_operand.vmem [shape: f32[1,64], index: 5, kind: input, shape index: {}]   ;;  %s570_s6 = inlined_call_operand.vmem [shape: f32[1,64], index: 6, kind: input, shape index: {}]   ;;  %s571_s7 = inlined_call_operand.vmem [shape: bf16[2,64], index: 7, kind: output, shape index: {}]  }
   0x1   :  { %v403_v0 = vld [vmem:[%s564_s1 + $0x4] ss:$8 sps:$4 sm:$0xff]   ;;  %124 = vmatprep.mubr.bf16.mxu0 %v433_v1  ;;  %v405_v2 = vld [vmem:[%s564_s1] ss:$8 sps:$4 sm:$0xff]   ;;  %v406_v3 = vld [vmem:[%s564_s1 + $0x14] ss:$8 sps:$4 sm:$0xff]  }
   0x2   :  { %92 = vmatprep.subr.bf16.mxu0 %v403_v0  ;;  %v408_v4 = vld [vmem:[%s564_s1 + $0x10] ss:$8 sps:$4 sm:$0xff]   ;;  %v409_v5 = vld [vmem:[%s564_s1 + $0x24] ss:$8 sps:$4 sm:$0xff]   ;;  %v411_v6 = vld [vmem:[%s564_s1 + $0x20] ss:$8 sps:$4 sm:$0xff]  }
   0x3   :  { %93 = vmatpush1.bf16.msra.mxu0 %v405_v2  ;;  %v412_v7 = vld [vmem:[%s564_s1 + $0x34] ss:$8 sps:$4 sm:$0xff]   ;;  %v415_v8 = vld [vmem:[%s565_s3 + $0x40] sm:$0xff]   ;;  %v417_v10 = vld [vmem:[%s565_s3 + $0x48] sm:$0xff]   ;;  %v39_v27 = vshrl.u32 %v38_v26, 7  ;;  %vm346_vm2 = vcmask 516096  }
   0x4   :  { %94 = vmatprep.subr.bf16.mxu0 %v406_v3  ;;  %v416_v9 = vld [vmem:[%s565_s3] sm:$0xff]   ;;  %380 = vmatprep.subr.bf16.mxu1 %v415_v8  ;;  %v418_v11 = vld [vmem:[%s565_s3 + $0x8] sm:$0xff]   ;;  %v419_v12 = vld [vmem:[%s565_s3 + $0x50] sm:$0xff]  }
   0x5   :  { %381 = vmatpush3.bf16.msra.mxu1 %v416_v9  ;;  %v414_v13 = vld [vmem:[%s564_s1 + $0x30] ss:$8 sps:$4 sm:$0xff]   ;;  %v27_v16 = vld [vmem:[%s566_s0] sm:$0x1]  ;;  %v425_v20 = vld [vmem:[%s565_s3 + $0x68] sm:$0xff]   ;;  %v40_v28 = vsub.s32 0, %v39_v27 }
   0x6   :  { %382 = vmatprep.subr.bf16.mxu1 %v417_v10  ;;  %v420_v14 = vld [vmem:[%s565_s3 + $0x10] sm:$0xff]   ;;  %v421_v15 = vld [vmem:[%s565_s3 + $0x58] sm:$0xff]   ;;  %v423_v18 = vld [vmem:[%s565_s3 + $0x60] sm:$0xff]   ;;  %v44_v30 = vsub.s32 1, %v39_v27  ;;  %v312_v48 = vunpack.c.l.bf16 %v27_v16 }
   0x7   :  { %95 = vmatpush1.bf16.msra.mxu0 %v408_v4  ;;  %v422_v17 = vld [vmem:[%s565_s3 + $0x18] sm:$0xff]   ;;  %v424_v19 = vld [vmem:[%s565_s3 + $0x20] sm:$0xff]   ;;  %v426_v21 = vld [vmem:[%s565_s3 + $0x28] sm:$0xff]  }
   0x8   :  { %96 = vmatprep.subr.bf16.mxu0 %v409_v5  ;;  %v427_v22 = vld [vmem:[%s565_s3 + $0x70] sm:$0xff]   ;;  %v429_v24 = vld [vmem:[%s565_s3 + $0x78] sm:$0xff]   ;;  %v36_v29 = vld [vmem:[%s567_s2] sm:$0x3] }
   0x9   :  { %383 = vmatpush3.bf16.msra.mxu1 %v418_v11  ;;  %v428_v23 = vld [vmem:[%s565_s3 + $0x30] sm:$0xff]   ;;  %v430_v25 = vld [vmem:[%s565_s3 + $0x38] sm:$0xff]   ;;  %v41_v31 = vrot.slane %v36_v29, %v40_v28  ;;  %v45_v32 = vrot.slane %v36_v29, %v44_v30  ;;  %v361_v44 = vld [vmem:[%s568_s4] ss:$0 sm:$0xff] }
   0xa   :  { %384 = vmatprep.subr.bf16.mxu1 %v419_v12  ;;  %v378_v62 = vld [vmem:[%s569_s5] ss:$0 sm:$0xff] }
   0xb   :  { %97 = vmatpush1.bf16.msra.mxu0 %v411_v6  ;;  %v379_v0 = vld [vmem:[%s570_s6] ss:$0 sm:$0xff] }
   0xc   :  { %98 = vmatprep.subr.bf16.mxu0 %v412_v7 }
   0xd   :  { %385 = vmatpush3.bf16.msra.mxu1 %v420_v14 }
   0xe   :  { %386 = vmatprep.subr.bf16.mxu1 %v421_v15 }
   0xf   :  { %99 = vmatpush1.bf16.msra.mxu0 %v414_v13 }
  0x11   :  { %387 = vmatpush3.bf16.msra.mxu1 %v422_v17 }
  0x12   :  { %360 = vmatmul.mubr.msk.bf16.vlgmr.msra.gmra.mrb[0].mxu0 %vm88_vm0, %v27_v16  ;;  %388 = vmatprep.subr.bf16.mxu1 %v423_v18 }
  0x15   :  { %389 = vmatpush3.bf16.msra.mxu1 %v424_v19 }
  0x16   :  { %390 = vmatprep.subr.bf16.mxu1 %v425_v20 }
  0x19   :  { %391 = vmatpush3.bf16.msra.mxu1 %v426_v21 }
  0x1a   :  { %392 = vmatprep.subr.bf16.mxu1 %v427_v22 }
  0x1d   :  { %393 = vmatpush3.bf16.msra.mxu1 %v428_v23 }
  0x1e   :  { %394 = vmatprep.subr.bf16.mxu1 %v429_v24 }
  0x21   :  { %395 = vmatpush3.bf16.msra.mxu1 %v430_v25 }
  0xe5   :  { %v126_v33 = vpop.f32.mrb[0].mxu0 }
  0xe6   :  { %v127_v34 = vadd.f32 %v126_v33, %v41_v31  ;;  %v128_v35 = vpop.f32.mrb[1].mxu0 }
  0xe7   :  { %v129_v36 = vadd.f32 %v128_v35, %v45_v32  ;;  %v130_v37 = vpop.f32.mrb[2].mxu0 }
  0xe8   :  { %v133_v38 = vmax.f32 %v127_v34, 0.0  ;;  %v131_v39 = vpop.f32.mrb[3].mxu0 }
  0xe9   :  { %v134_v40 = vmax.f32 %v129_v36, 0.0 }
  0xea   :  { %v135_v42 = vpack.c.bf16 %v133_v38, %v133_v38 }
  0xeb   :  { %v136_v41 = vpack.c.bf16 %v134_v40, %v134_v40 }
  0xed   :  { %304 = vmatprep.mubr.bf16.mxu1 %v136_v41 }
  0xee   :  { %305 = vmatmul.mubr.bf16.vlgmr.msra.gmra.mrb[0].mxu1 %v135_v42 }
 0x1c1   :  { %v396_v43 = vpop.f32.mrb[0].mxu1 }
 0x1c2   :  { %v397_v45 = vpop.f32.mrb[1].mxu1 }
 0x1c3   :  { %v398_v46 = vadd.f32 %v397_v45, %v396_v43  ;;  %v399_v47 = vpop.f32.mrb[2].mxu1 }
 0x1c4   :  { %v400_v49 = vpop.f32.mrb[3].mxu1 }
 0x1c5   :  { %v307_v50 = vadd.f32 %v398_v46, %v361_v44 }
 0x1c7   :  { %v313_v51 = vadd.f32 %v312_v48, %v307_v50 }
 0x1c9   :  { %v315_v52 = vsel %vm314_vm1, %v313_v51, 0.0 }
 0x1ca   :  { %316 = vadd.xlane.f32.xlu0 %v315_v52 }
 0x257   :  { %v317_v53 = vpop.xlane.xlu0 %316 }
 0x258   :  { %v319_v54 = vmul.f32 0.015625, %v317_v53 }
 0x25a   :  { %v320_v55 = vsub.f32 %v313_v51, %v319_v54 }
 0x25c   :  { %v321_v56 = vmul.f32 %v320_v55, %v320_v55 }
 0x25e   :  { %v322_v57 = vsel %vm314_vm1, %v321_v56, 0.0 }
 0x25f   :  { %323 = vadd.xlane.f32.xlu0 %v322_v57 }
 0x2ec   :  { %v324_v58 = vpop.xlane.xlu0 %323 }
 0x2ed   :  { %v325_v59 = vmul.f32 0.015625, %v324_v58 }
 0x2ef   :  { %v326_v60 = vadd.f32 1e-05, %v325_v59 }
 0x2f1   :  { %431 = vrsqrt.f32 %v326_v60 }
 0x2fb   :  { %v432_v61 = vpop.eup %431 }
 0x2fc   :  { %v328_v63 = vmul.f32 %v432_v61, %v320_v55 }
 0x2fe   :  { %v336_v1 = vmul.f32 %v378_v62, %v328_v63 }
 0x300   :  { %v344_v2 = vadd.f32 %v379_v0, %v336_v1 }
 0x302   :  { %v345_v3 = vpack.c.bf16 %v344_v2, %v344_v2 }
 0x304   :  { %347 = vst.msk [vmem:[%s571_s7] sm:$0x1] %vm346_vm2, %v345_v3 }

</bundles_post_ra>
